<compile_context>
chip_gen: v7x
topology: tpu7x:2x2x1
jax: 0.10.0
libtpu: 0.0.40
codegen_flags: <defaults>
</compile_context>

<pallas_src>
import functools

import jax
import jax.numpy as jnp
import numpy as np
from jax.experimental import pallas as pl
from jax.experimental.pallas import tpu as pltpu

EPS = 1e-5
_VMEM_LIMIT_BYTES = 48 * 1024 * 1024   # < v7x's 64 MiB physical; fine on v5e/v6e


# ---------------------------------------------------------------------------
# In-kernel helpers
# ---------------------------------------------------------------------------
def _slab(ref, start, count, stride):
    """Rows start, start+stride, ... (count of them) along axis 1."""
    if stride == 1:
        return ref[:, start:start + count, :]
    # TODO(synk): for stride > 1, pre-deinterleave H in the wrapper instead of
    # a strided in-kernel slice (correct but not optimal).
    return jax.lax.slice_in_dim(ref[...], start,
                                start + (count - 1) * stride + 1,
                                stride=stride, axis=1)


def _row_stats(y):
    """(2, lanes) rows: per-lane sum and sum-of-squares of an f32 2-D slab."""
    return jnp.concatenate([jnp.sum(y, axis=0, keepdims=True),
                            jnp.sum(y * y, axis=0, keepdims=True)], axis=0)


def _conv_matmul(src, w_ref, kh, ho, stride):
    """kh-shifted row slabs -> one (M, KH*W*C) x (KH*W*C, Wo*Cout) MXU matmul."""
    slabs = [_slab(src, i, ho, stride) for i in range(kh)]
    lhs = jnp.concatenate(slabs, axis=-1) if kh > 1 else slabs[0]
    bb = lhs.shape[0]
    lhs = lhs.reshape(bb * ho, -1)
    return jnp.dot(lhs, w_ref[...], preferred_element_type=jnp.float32)


# ---------------------------------------------------------------------------
# Pallas kernels
# ---------------------------------------------------------------------------
def _stage1_kernel(x_ref, w1_ref, b1_ref, *rest, k0, stride, pad, proj):
    """conv1 (+ 1x1 projection shortcut) for one batch block, plus per-block
    BatchNorm partial statistics taken from the f32 accumulator."""
    if proj:
        wsc_ref, y1_ref, st1_ref, ysc_ref, stsc_ref = rest
    else:
        y1_ref, st1_ref = rest

    bb, ho1, wl1 = y1_ref.shape
    y1 = _conv_matmul(x_ref, w1_ref, k0, ho1, stride) + b1_ref[...]
    st1_ref[...] = _row_stats(y1)                       # stats from f32, pre-cast
    y1_ref[...] = y1.reshape(bb, ho1, wl1).astype(y1_ref.dtype)

    if proj:
        _, hsc, wlsc = ysc_ref.shape
        xs = _slab(x_ref, pad, hsc, stride).reshape(bb * hsc, -1)
        ysc = jnp.dot(xs, wsc_ref[...], preferred_element_type=jnp.float32)
        stsc_ref[...] = _row_stats(ysc)
        ysc_ref[...] = ysc.reshape(bb, hsc, wlsc).astype(ysc_ref.dtype)


def _stage2_kernel(y1_ref, sc1_ref, sh1_ref, w2_ref, b2_ref,
                   y2_ref, st2_ref, pad_ref, *, k1, stride, pad):
    """bn1 (precomputed scale/shift rows) + relu + conv2 for one batch block.
    The normalized intermediate never round-trips HBM."""
    bb, ho1, wl1 = y1_ref.shape
    _, ho2, wl2 = y2_ref.shape
    hp = pad_ref.shape[1]

    a1 = jnp.maximum(y1_ref[...].astype(jnp.float32) * sc1_ref[...][None]
                     + sh1_ref[...][None], 0.0)
    # Zero-padded activation lives in a VMEM scratch; pad rows are cheaply
    # re-zeroed every step so the grid axis stays megacore-parallel safe.
    if pad > 0:
        pad_ref[:, 0:pad, :] = jnp.zeros((bb, pad, wl1), pad_ref.dtype)
        pad_ref[:, pad + ho1:hp, :] = jnp.zeros((bb, hp - pad - ho1, wl1),
                                                pad_ref.dtype)
    pad_ref[:, pad:pad + ho1, :] = a1.astype(pad_ref.dtype)

    y2 = _conv_matmul(pad_ref, w2_ref, k1, ho2, stride) + b2_ref[...]
    st2_ref[...] = _row_stats(y2)
    y2_ref[...] = y2.reshape(bb, ho2, wl2).astype(y2_ref.dtype)


def _stage3_kernel(y2_ref, sc2_ref, sh2_ref, *rest, proj):
    """bn2 + shortcut(-bn) + residual add + relu on lane-dense row tiles."""
    if proj:
        ysc_ref, scs_ref, shs_ref, o_ref = rest
        shortcut = ysc_ref[...].astype(jnp.float32) * scs_ref[...] + shs_ref[...]
    else:
        xs_ref, o_ref = rest
        shortcut = xs_ref[...].astype(jnp.float32)
    out = y2_ref[...].astype(jnp.float32) * sc2_ref[...] + sh2_ref[...] + shortcut
    o_ref[...] = jnp.maximum(out, 0.0)


# ---------------------------------------------------------------------------
# Wrapper-side layout / parameter prep (pure glue; fused under jit)
# ---------------------------------------------------------------------------
def _band_weight(w_oihw, w_in, stride, pad):
    """Conv weight (O, I, KH, KW) -> banded matmul weight (KH*w_in*I, w_out*O)
    for channels-last (w-major, c-minor) row slabs.  W zero-padding is folded
    in (out-of-range taps dropped).  Exact f32 mask-multiply-sum."""
    o, i, kh, kw = w_oihw.shape
    w_out = (w_in + 2 * pad - kw) // stride + 1
    # tap[b, wo]: input column feeding output column wo through kernel tap b
    tap = jnp.arange(w_out)[None, :] * stride + jnp.arange(kw)[:, None] - pad
    sel = (jnp.arange(w_in)[:, None, None] == tap[None, :, :]).astype(jnp.float32)
    wt = jnp.transpose(w_oihw, (2, 3, 1, 0)).astype(jnp.float32)        # (KH,KW,I,O)
    band = jnp.sum(sel[None, :, :, None, :, None]                       # (1,Wi,KW,1,Wo,1)
                   * wt[:, None, :, :, None, :],                        # (KH,1,KW,I,1,O)
                   axis=2)                                              # (KH,Wi,I,Wo,O)
    return band.reshape(kh * w_in * i, w_out * o)


def _tile_row(v, reps):
    """Per-channel vector -> (1, reps*C) row matching the (w, c) lane layout."""
    return jnp.tile(v.astype(jnp.float32), reps).reshape(1, -1)


def _bn_rows(partials, gamma, beta, w_out, c, count, eps):
    """Reduce per-block (sum, sum^2) partials -> per-lane BN scale/shift rows.
    Biased variance == PyTorch BatchNorm training-mode semantics."""
    s = jnp.sum(partials, axis=0).reshape(2, w_out, c).sum(axis=1)      # (2, C)
    mean = s[0] / count
    var = s[1] / count - mean * mean
    scale = gamma.astype(jnp.float32) * jax.lax.rsqrt(var + eps)
    shift = beta.astype(jnp.float32) - mean * scale
    return _tile_row(scale, w_out), _tile_row(shift, w_out)


def _batch_block(n, rows_per_image, target_rows=256):
    """Smallest divisor of n whose block reaches ~256 matmul rows (else n)."""
    for b in range(1, n + 1):
        if n % b == 0 and b * rows_per_image >= target_rows:
            return b
    return n


def _row_tile(rows, cap=512):
    """Largest multiple-of-8 divisor of `rows` up to `cap` (else `rows`)."""
    best = rows
    for t in range(8, min(rows, cap) + 1, 8):
        if rows % t == 0:
            best = t
    return best


def init_params(key, in_channels, out_channels, kernel_size):
    c_in0, _ = in_channels
    c_out0, c_out1 = out_channels
    k0, k1 = kernel_size
    ks = jax.random.split(key, 12)
    p = {
        "w1": 0.2 * jax.random.normal(ks[0], (c_out0, c_in0, k0, k0), jnp.float32),
        "b1": 0.1 * jax.random.normal(ks[1], (c_out0,), jnp.float32),
        "g1": 1.0 + 0.1 * jax.random.normal(ks[2], (c_out0,), jnp.float32),
        "beta1": 0.1 * jax.random.normal(ks[3], (c_out0,), jnp.float32),
        "w2": 0.2 * jax.random.normal(ks[4], (c_out1, c_out0, k1, k1), jnp.float32),
        "b2": 0.1 * jax.random.normal(ks[5], (c_out1,), jnp.float32),
        "g2": 1.0 + 0.1 * jax.random.normal(ks[6], (c_out1,), jnp.float32),
        "beta2": 0.1 * jax.random.normal(ks[7], (c_out1,), jnp.float32),
    }
    if c_in0 != c_out1:
        p["wsc"] = 0.2 * jax.random.normal(ks[8], (c_out1, c_in0, 1, 1), jnp.float32)
        p["gsc"] = 1.0 + 0.1 * jax.random.normal(ks[9], (c_out1,), jnp.float32)
        p["betasc"] = 0.1 * jax.random.normal(ks[10], (c_out1,), jnp.float32)
    return p


# ---------------------------------------------------------------------------
# Forward pass
# ---------------------------------------------------------------------------
def res_block2_forward(x_nchw, params, in_channels, out_channels, strides,
                       kernel_size=(3, 3), eps=EPS, mxu_dtype=jnp.bfloat16):
    """Pallas ResBlock2.forward (training-mode BatchNorm); NCHW in/out."""
    n, cin, h, w = x_nchw.shape
    c_in0, c_in1 = in_channels
    c1, c2 = out_channels
    k0, k1 = kernel_size
    s0, s1 = strides
    p0, p1 = k0 // 2, k1 // 2
    assert cin == c_in0 and c_in1 == c1

    ho1 = (h + 2 * p0 - k0) // s0 + 1
    wo1 = (w + 2 * p0 - k0) // s0 + 1
    ho2 = (ho1 + 2 * p1 - k1) // s1 + 1
    wo2 = (wo1 + 2 * p1 - k1) // s1 + 1
    proj = (c_in0 != c2)
    if proj:
        hsc = (h - 1) // s0 + 1
        wsc = (w - 1) // s0 + 1
        assert (hsc, wsc) == (ho2, wo2), "residual shapes must match"
    else:
        assert (h, w, c_in0) == (ho2, wo2, c2), "identity residual must match"
        hsc = wsc = None

    win1 = w * c_in0          # input row lane width
    wl1 = wo1 * c1            # conv1 output lane width (lane dense)
    wl2 = wo2 * c2            # conv2 / block output lane width (lane dense)
    hp1 = h + 2 * p0
    f32 = jnp.float32

    # ---- banded weights + per-lane bias rows (O(params) prep, under jit) ----
    w1f = _band_weight(params["w1"], w, s0, p0).astype(mxu_dtype)       # (k0*win1, wl1)
    w2f = _band_weight(params["w2"], wo1, s1, p1).astype(mxu_dtype)     # (k1*wl1, wl2)
    b1t = _tile_row(params["b1"], wo1)
    b2t = _tile_row(params["b2"], wo2)
    if proj:
        wlsc = wsc * c2
        wscf = _band_weight(params["wsc"], w, s0, 0).astype(mxu_dtype)  # (win1, wlsc)

    x_nhwc = jnp.transpose(x_nchw, (0, 2, 3, 1)).astype(f32)            # (N,H,W,Cin)
    xh = jnp.pad(x_nhwc, ((0, 0), (p0, p0), (0, 0), (0, 0)))
    xh = xh.reshape(n, hp1, win1).astype(mxu_dtype)

    bb = _batch_block(n, ho1)          # images per grid step (M = bb*Ho rows)
    nb = n // bb
    cp = pltpu.CompilerParams(dimension_semantics=("parallel",),
                              vmem_limit_bytes=_VMEM_LIMIT_BYTES)

    # ---------------- stage 1: conv1 (+ projection) + partial stats ---------
    in_specs = [pl.BlockSpec((bb, hp1, win1), lambda i: (i, 0, 0)),
                pl.BlockSpec((k0 * win1, wl1), lambda i: (0, 0)),        # resident
                pl.BlockSpec((1, wl1), lambda i: (0, 0))]
    args = [xh, w1f, b1t]
    out_shape = [jax.ShapeDtypeStruct((n, ho1, wl1), mxu_dtype),
                 jax.ShapeDtypeStruct((nb, 2, wl1), f32)]
    out_specs = [pl.BlockSpec((bb, ho1, wl1), lambda i: (i, 0, 0)),
                 pl.BlockSpec((None, 2, wl1), lambda i: (i, 0, 0))]
    if proj:
        in_specs.append(pl.BlockSpec((win1, wlsc), lambda i: (0, 0)))
        args.append(wscf)
        out_shape += [jax.ShapeDtypeStruct((n, hsc, wlsc), mxu_dtype),
                      jax.ShapeDtypeStruct((nb, 2, wlsc), f32)]
        out_specs += [pl.BlockSpec((bb, hsc, wlsc), lambda i: (i, 0, 0)),
                      pl.BlockSpec((None, 2, wlsc), lambda i: (i, 0, 0))]

    res1 = pl.pallas_call(
        functools.partial(_stage1_kernel, k0=k0, stride=s0, pad=p0, proj=proj),
        grid=(nb,), in_specs=in_specs, out_specs=out_specs,
        out_shape=out_shape, compiler_params=cp,
    )(*args)
    if proj:
        y1, st1p, ysc, stscp = res1
    else:
        y1, st1p = res1

    # Exact batch stats -> per-lane BN scale/shift rows (tiny glue, hoisted).
    sc1, sh1 = _bn_rows(st1p, params["g1"], params["beta1"], wo1, c1,
                        float(n * ho1 * wo1), eps)

    # ---------------- stage 2: bn1 + relu + conv2 + partial stats ------------
    hp2 = ho1 + 2 * p1
    y2, st2p = pl.pallas_call(
        functools.partial(_stage2_kernel, k1=k1, stride=s1, pad=p1),
        grid=(nb,),
        in_specs=[pl.BlockSpec((bb, ho1, wl1), lambda i: (i, 0, 0)),
                  pl.BlockSpec((1, wl1), lambda i: (0, 0)),
                  pl.BlockSpec((1, wl1), lambda i: (0, 0)),
                  pl.BlockSpec((k1 * wl1, wl2), lambda i: (0, 0)),       # resident
                  pl.BlockSpec((1, wl2), lambda i: (0, 0))],
        out_specs=[pl.BlockSpec((bb, ho2, wl2), lambda i: (i, 0, 0)),
                   pl.BlockSpec((None, 2, wl2), lambda i: (i, 0, 0))],
        out_shape=[jax.ShapeDtypeStruct((n, ho2, wl2), mxu_dtype),
                   jax.ShapeDtypeStruct((nb, 2, wl2), f32)],
        scratch_shapes=[pltpu.VMEM((bb, hp2, wl1), mxu_dtype)],
        compiler_params=cp,
    )(y1, sc1, sh1, w2f, b2t)

    sc2, sh2 = _bn_rows(st2p, params["g2"], params["beta2"], wo2, c2,
                        float(n * ho2 * wo2), eps)

    # ---------------- stage 3: bn2 + shortcut(-bn) + add + relu --------------
    rows = n * ho2
    tr = _row_tile(rows)
    in_specs = [pl.BlockSpec((tr, wl2), lambda j: (j, 0)),
                pl.BlockSpec((1, wl2), lambda j: (0, 0)),
                pl.BlockSpec((1, wl2), lambda j: (0, 0))]
    args = [y2.reshape(rows, wl2), sc2, sh2]
    if proj:
        scs, shs = _bn_rows(stscp, params["gsc"], params["betasc"], wsc, c2,
                            float(n * hsc * wsc), eps)
        in_specs += [pl.BlockSpec((tr, wlsc), lambda j: (j, 0)),
                     pl.BlockSpec((1, wlsc), lambda j: (0, 0)),
                     pl.BlockSpec((1, wlsc), lambda j: (0, 0))]
        args += [ysc.reshape(rows, wlsc), scs, shs]
    else:
        in_specs.append(pl.BlockSpec((tr, wl2), lambda j: (j, 0)))
        args.append(x_nhwc.reshape(rows, wl2))

    out = pl.pallas_call(
        functools.partial(_stage3_kernel, proj=proj),
        grid=(rows // tr,),
        in_specs=in_specs,
        out_specs=pl.BlockSpec((tr, wl2), lambda j: (j, 0)),
        out_shape=jax.ShapeDtypeStruct((rows, wl2), f32),
        compiler_params=cp,
    )(*args)

    return jnp.transpose(out.reshape(n, ho2, wo2, c2), (0, 3, 1, 2))


# ---------------------------------------------------------------------------
# Pure-JAX reference (correctness check only)
# ---------------------------------------------------------------------------
def _ref_conv(x, w, b, stride, pad):
    y = jax.lax.conv_general_dilated(
        x, w, (stride, stride), ((pad, pad), (pad, pad)),
        dimension_numbers=("NCHW", "OIHW", "NCHW"),
        precision=jax.lax.Precision.HIGHEST)
    if b is not None:
        y = y + b[None, :, None, None]
    return y


def _ref_bn(y, g, b, eps=EPS):
    mean = jnp.mean(y, axis=(0, 2, 3), keepdims=True)
    var = jnp.mean(jnp.square(y - mean), axis=(0, 2, 3), keepdims=True)
    return (y - mean) * jax.lax.rsqrt(var + eps) * g[None, :, None, None] \
        + b[None, :, None, None]


def res_block2_reference(x, params, in_channels, out_channels, strides,
                         kernel_size=(3, 3)):
    c_in0, _ = in_channels
    _, c_out1 = out_channels
    k0, k1 = kernel_size
    s0, s1 = strides
    out = jax.nn.relu(_ref_bn(_ref_conv(x, params["w1"], params["b1"], s0, k0 // 2),
                              params["g1"], params["beta1"]))
    out = _ref_bn(_ref_conv(out, params["w2"], params["b2"], s1, k1 // 2),
                  params["g2"], params["beta2"])
    if c_in0 != c_out1:
        sc = _ref_bn(_ref_conv(x, params["wsc"], None, s0, 0),
                     params["gsc"], params["betasc"])
    else:
        sc = x
    return jax.nn.relu(out + sc)


if __name__ == "__main__":
    key = jax.random.PRNGKey(0)
    kx, kp, kx2, kp2 = jax.random.split(key, 4)

    fwd = jax.jit(res_block2_forward,
                  static_argnames=("in_channels", "out_channels", "strides",
                                   "kernel_size", "eps", "mxu_dtype"))

    # --- config 1: projection shortcut (in_channels[0] != out_channels[1]) ---
    in_ch, out_ch = (4, 8), (8, 8)
    strides, ksize = (1, 1), (3, 3)
    x = jax.random.normal(kx, (2, 4, 16, 16), jnp.float32)          # NCHW
    params = init_params(kp, in_ch, out_ch, ksize)

    y = jax.block_until_ready(fwd(x, params, in_channels=in_ch,
                                  out_channels=out_ch, strides=strides,
                                  kernel_size=ksize, mxu_dtype=jnp.float32))
    y_ref = res_block2_reference(x, params, in_ch, out_ch, strides, ksize)
    np.testing.assert_allclose(np.asarray(y), np.asarray(y_ref),
                               rtol=1e-3, atol=1e-3)

    # Default bf16 MXU operands / bf16 intermediates (f32 accumulation and
    # f32 BN statistics) checked against the f32 reference at a loose bound.
    y_bf16 = jax.block_until_ready(fwd(x, params, in_channels=in_ch,
                                       out_channels=out_ch, strides=strides,
                                       kernel_size=ksize))
    np.testing.assert_allclose(np.asarray(y_bf16), np.asarray(y_ref),
                               rtol=2e-1, atol=2e-1)

    # --- config 2: identity shortcut (in_channels[0] == out_channels[1]) -----
    in_ch2, out_ch2 = (8, 8), (8, 8)
    x2 = jax.random.normal(kx2, (2, 8, 16, 16), jnp.float32)
    params2 = init_params(kp2, in_ch2, out_ch2, ksize)
    y2 = jax.block_until_ready(fwd(x2, params2, in_channels=in_ch2,
                                   out_channels=out_ch2, strides=strides,
                                   kernel_size=ksize, mxu_dtype=jnp.float32))
    y2_ref = res_block2_reference(x2, params2, in_ch2, out_ch2, strides, ksize)
    np.testing.assert_allclose(np.asarray(y2), np.asarray(y2_ref),
                               rtol=1e-3, atol=1e-3)

    print("KERNEL_OK")
</pallas_src>

<mosaic_0001>
module attributes {stable_mosaic.version = 11 : i64} {
  func.func @_stage1_kernel(%arg0: i32, %arg1: memref<2x18x64xf32, #tpu.memory_space<vmem>>, %arg2: memref<192x128xf32, #tpu.memory_space<vmem>>, %arg3: memref<1x128xf32, #tpu.memory_space<vmem>>, %arg4: memref<64x128xf32, #tpu.memory_space<vmem>>, %arg5: memref<2x16x128xf32, #tpu.memory_space<vmem>>, %arg6: memref<1x2x128xf32, #tpu.memory_space<vmem>>, %arg7: memref<2x16x128xf32, #tpu.memory_space<vmem>>, %arg8: memref<1x2x128xf32, #tpu.memory_space<vmem>>) attributes {dimension_semantics = [#tpu.dimension_semantics<parallel>], iteration_bounds = array<i64: 1>, scalar_prefetch = 0 : i64, scratch_operands = 0 : i64, tpu.core_type = #tpu.core_type<tc>, window_params = [{transform_indices = @transform_0, window_bounds = array<i64: 2, 18, 64>}, {pipeline_mode = #tpu.pipeline_mode<synchronous>, transform_indices = @transform_1, window_bounds = array<i64: 192, 128>}, {pipeline_mode = #tpu.pipeline_mode<synchronous>, transform_indices = @transform_2, window_bounds = array<i64: 1, 128>}, {pipeline_mode = #tpu.pipeline_mode<synchronous>, transform_indices = @transform_3, window_bounds = array<i64: 64, 128>}, {transform_indices = @transform_4, window_bounds = array<i64: 2, 16, 128>}, {transform_indices = @transform_5, window_bounds = array<i64: 1, 2, 128>}, {transform_indices = @transform_6, window_bounds = array<i64: 2, 16, 128>}, {transform_indices = @transform_7, window_bounds = array<i64: 1, 2, 128>}]} {
    %c0 = arith.constant 0 : index
    %c0_0 = arith.constant 0 : index
    %c0_1 = arith.constant 0 : index
    %0 = vector.load %arg1[%c0, %c0_0, %c0_1] : memref<2x18x64xf32, #tpu.memory_space<vmem>>, vector<2x16x64xf32>
    %c0_2 = arith.constant 0 : index
    %c1 = arith.constant 1 : index
    %c0_3 = arith.constant 0 : index
    %1 = vector.load %arg1[%c0_2, %c1, %c0_3] : memref<2x18x64xf32, #tpu.memory_space<vmem>>, vector<2x16x64xf32>
    %c0_4 = arith.constant 0 : index
    %c2 = arith.constant 2 : index
    %c0_5 = arith.constant 0 : index
    %2 = vector.load %arg1[%c0_4, %c2, %c0_5] : memref<2x18x64xf32, #tpu.memory_space<vmem>>, vector<2x16x64xf32>
    %3 = tpu.concatenate %0, %1, %2 in 2 : vector<2x16x64xf32>, vector<2x16x64xf32>, vector<2x16x64xf32> -> vector<2x16x192xf32>
    %4 = vector.shape_cast %3 : vector<2x16x192xf32> to vector<32x192xf32>
    %c0_6 = arith.constant 0 : index
    %c0_7 = arith.constant 0 : index
    %5 = vector.load %arg2[%c0_6, %c0_7] : memref<192x128xf32, #tpu.memory_space<vmem>>, vector<192x128xf32>
    %cst = arith.constant dense<0.000000e+00> : vector<32x128xf32>
    %6 = tpu.matmul %4, %5, %cst {dimension_numbers = #tpu.dot_dimension_numbers<[1], [0], [0], [1], [0, 0, 1, 1], [], []>} : vector<32x192xf32>, vector<192x128xf32>, vector<32x128xf32> -> vector<32x128xf32>
    %c0_8 = arith.constant 0 : index
    %c0_9 = arith.constant 0 : index
    %7 = vector.load %arg3[%c0_8, %c0_9] : memref<1x128xf32, #tpu.memory_space<vmem>>, vector<1x128xf32>
    %8 = vector.broadcast %7 : vector<1x128xf32> to vector<32x128xf32>
    %9 = arith.addf %6, %8 : vector<32x128xf32>
    %cst_10 = arith.constant dense<0.000000e+00> : vector<128xf32>
    %10 = vector.multi_reduction <add>, %9, %cst_10 [0] : vector<32x128xf32> to vector<128xf32>
    %11 = vector.shape_cast %10 : vector<128xf32> to vector<1x128xf32>
    %12 = arith.mulf %9, %9 : vector<32x128xf32>
    %cst_11 = arith.constant dense<0.000000e+00> : vector<128xf32>
    %13 = vector.multi_reduction <add>, %12, %cst_11 [0] : vector<32x128xf32> to vector<128xf32>
    %14 = vector.shape_cast %13 : vector<128xf32> to vector<1x128xf32>
    %15 = tpu.concatenate %11, %14 in 0 : vector<1x128xf32>, vector<1x128xf32> -> vector<2x128xf32>
    %c0_12 = arith.constant 0 : index
    %c0_13 = arith.constant 0 : index
    %c0_14 = arith.constant 0 : index
    %16 = vector.load %arg6[%c0_12, %c0_13, %c0_14] : memref<1x2x128xf32, #tpu.memory_space<vmem>>, vector<1x2x128xf32>
    %17 = vector.shape_cast %16 : vector<1x2x128xf32> to vector<2x128xf32>
    %18 = vector.shape_cast %15 : vector<2x128xf32> to vector<1x2x128xf32>
    tpu.vector_store %arg6[%c0_12, %c0_13, %c0_14], %18 {strides = array<i32>} : memref<1x2x128xf32, #tpu.memory_space<vmem>>, vector<1x2x128xf32>,
    %19 = vector.shape_cast %9 : vector<32x128xf32> to vector<2x16x128xf32>
    %c0_15 = arith.constant 0 : index
    %c0_16 = arith.constant 0 : index
    %c0_17 = arith.constant 0 : index
    %20 = vector.load %arg5[%c0_15, %c0_16, %c0_17] : memref<2x16x128xf32, #tpu.memory_space<vmem>>, vector<2x16x128xf32>
    tpu.vector_store %arg5[%c0_15, %c0_16, %c0_17], %19 {strides = array<i32>} : memref<2x16x128xf32, #tpu.memory_space<vmem>>, vector<2x16x128xf32>,
    %c0_18 = arith.constant 0 : index
    %c1_19 = arith.constant 1 : index
    %c0_20 = arith.constant 0 : index
    %21 = vector.load %arg1[%c0_18, %c1_19, %c0_20] : memref<2x18x64xf32, #tpu.memory_space<vmem>>, vector<2x16x64xf32>
    %22 = vector.shape_cast %21 : vector<2x16x64xf32> to vector<32x64xf32>
    %c0_21 = arith.constant 0 : index
    %c0_22 = arith.constant 0 : index
    %23 = vector.load %arg4[%c0_21, %c0_22] : memref<64x128xf32, #tpu.memory_space<vmem>>, vector<64x128xf32>
    %cst_23 = arith.constant dense<0.000000e+00> : vector<32x128xf32>
    %24 = tpu.matmul %22, %23, %cst_23 {dimension_numbers = #tpu.dot_dimension_numbers<[1], [0], [0], [1], [0, 0, 1, 1], [], []>} : vector<32x64xf32>, vector<64x128xf32>, vector<32x128xf32> -> vector<32x128xf32>
    %cst_24 = arith.constant dense<0.000000e+00> : vector<128xf32>
    %25 = vector.multi_reduction <add>, %24, %cst_24 [0] : vector<32x128xf32> to vector<128xf32>
    %26 = vector.shape_cast %25 : vector<128xf32> to vector<1x128xf32>
    %27 = arith.mulf %24, %24 : vector<32x128xf32>
    %cst_25 = arith.constant dense<0.000000e+00> : vector<128xf32>
    %28 = vector.multi_reduction <add>, %27, %cst_25 [0] : vector<32x128xf32> to vector<128xf32>
    %29 = vector.shape_cast %28 : vector<128xf32> to vector<1x128xf32>
    %30 = tpu.concatenate %26, %29 in 0 : vector<1x128xf32>, vector<1x128xf32> -> vector<2x128xf32>
    %c0_26 = arith.constant 0 : index
    %c0_27 = arith.constant 0 : index
    %c0_28 = arith.constant 0 : index
    %31 = vector.load %arg8[%c0_26, %c0_27, %c0_28] : memref<1x2x128xf32, #tpu.memory_space<vmem>>, vector<1x2x128xf32>
    %32 = vector.shape_cast %31 : vector<1x2x128xf32> to vector<2x128xf32>
    %33 = vector.shape_cast %30 : vector<2x128xf32> to vector<1x2x128xf32>
    tpu.vector_store %arg8[%c0_26, %c0_27, %c0_28], %33 {strides = array<i32>} : memref<1x2x128xf32, #tpu.memory_space<vmem>>, vector<1x2x128xf32>,
    %34 = vector.shape_cast %24 : vector<32x128xf32> to vector<2x16x128xf32>
    %c0_29 = arith.constant 0 : index
    %c0_30 = arith.constant 0 : index
    %c0_31 = arith.constant 0 : index
    %35 = vector.load %arg7[%c0_29, %c0_30, %c0_31] : memref<2x16x128xf32, #tpu.memory_space<vmem>>, vector<2x16x128xf32>
    tpu.vector_store %arg7[%c0_29, %c0_30, %c0_31], %34 {strides = array<i32>} : memref<2x16x128xf32, #tpu.memory_space<vmem>>, vector<2x16x128xf32>,
    return
  }
  func.func @transform_0(%arg0: i32) -> (i32, i32, i32) {
    %c0_i32 = arith.constant 0 : i32
    %c0_i32_0 = arith.constant 0 : i32
    %c0_i32_1 = arith.constant 0 : i32
    return %arg0, %c0_i32, %c0_i32_0 : i32, i32, i32
  }
  func.func @transform_1(%arg0: i32) -> (i32, i32) {
    %c0_i32 = arith.constant 0 : i32
    %c0_i32_0 = arith.constant 0 : i32
    %c0_i32_1 = arith.constant 0 : i32
    return %c0_i32, %c0_i32_0 : i32, i32
  }
  func.func @transform_2(%arg0: i32) -> (i32, i32) {
    %c0_i32 = arith.constant 0 : i32
    %c0_i32_0 = arith.constant 0 : i32
    %c0_i32_1 = arith.constant 0 : i32
    return %c0_i32, %c0_i32_0 : i32, i32
  }
  func.func @transform_3(%arg0: i32) -> (i32, i32) {
    %c0_i32 = arith.constant 0 : i32
    %c0_i32_0 = arith.constant 0 : i32
    %c0_i32_1 = arith.constant 0 : i32
    return %c0_i32, %c0_i32_0 : i32, i32
  }
  func.func @transform_4(%arg0: i32) -> (i32, i32, i32) {
    %c0_i32 = arith.constant 0 : i32
    %c0_i32_0 = arith.constant 0 : i32
    %c0_i32_1 = arith.constant 0 : i32
    return %arg0, %c0_i32, %c0_i32_0 : i32, i32, i32
  }
  func.func @transform_5(%arg0: i32) -> (i32, i32, i32) {
    %c0_i32 = arith.constant 0 : i32
    %c0_i32_0 = arith.constant 0 : i32
    %c0_i32_1 = arith.constant 0 : i32
    return %arg0, %c0_i32, %c0_i32_0 : i32, i32, i32
  }
  func.func @transform_6(%arg0: i32) -> (i32, i32, i32) {
    %c0_i32 = arith.constant 0 : i32
    %c0_i32_0 = arith.constant 0 : i32
    %c0_i32_1 = arith.constant 0 : i32
    return %arg0, %c0_i32, %c0_i32_0 : i32, i32, i32
  }
  func.func @transform_7(%arg0: i32) -> (i32, i32, i32) {
    %c0_i32 = arith.constant 0 : i32
    %c0_i32_0 = arith.constant 0 : i32
    %c0_i32_1 = arith.constant 0 : i32
    return %arg0, %c0_i32, %c0_i32_0 : i32, i32, i32
  }
}

module attributes {stable_mosaic.version = 11 : i64} {
  func.func @_stage2_kernel(%arg0: i32, %arg1: memref<2x16x128xf32, #tpu.memory_space<vmem>>, %arg2: memref<1x128xf32, #tpu.memory_space<vmem>>, %arg3: memref<1x128xf32, #tpu.memory_space<vmem>>, %arg4: memref<384x128xf32, #tpu.memory_space<vmem>>, %arg5: memref<1x128xf32, #tpu.memory_space<vmem>>, %arg6: memref<2x16x128xf32, #tpu.memory_space<vmem>>, %arg7: memref<1x2x128xf32, #tpu.memory_space<vmem>>, %arg8: memref<2x18x128xf32, #tpu.memory_space<vmem>>) attributes {dimension_semantics = [#tpu.dimension_semantics<parallel>], iteration_bounds = array<i64: 1>, scalar_prefetch = 0 : i64, scratch_operands = 1 : i64, tpu.core_type = #tpu.core_type<tc>, window_params = [{transform_indices = @transform_0, window_bounds = array<i64: 2, 16, 128>}, {pipeline_mode = #tpu.pipeline_mode<synchronous>, transform_indices = @transform_1, window_bounds = array<i64: 1, 128>}, {pipeline_mode = #tpu.pipeline_mode<synchronous>, transform_indices = @transform_2, window_bounds = array<i64: 1, 128>}, {pipeline_mode = #tpu.pipeline_mode<synchronous>, transform_indices = @transform_3, window_bounds = array<i64: 384, 128>}, {pipeline_mode = #tpu.pipeline_mode<synchronous>, transform_indices = @transform_4, window_bounds = array<i64: 1, 128>}, {transform_indices = @transform_5, window_bounds = array<i64: 2, 16, 128>}, {transform_indices = @transform_6, window_bounds = array<i64: 1, 2, 128>}]} {
    %c0 = arith.constant 0 : index
    %c0_0 = arith.constant 0 : index
    %c0_1 = arith.constant 0 : index
    %0 = vector.load %arg1[%c0, %c0_0, %c0_1] : memref<2x16x128xf32, #tpu.memory_space<vmem>>, vector<2x16x128xf32>
    %c0_2 = arith.constant 0 : index
    %c0_3 = arith.constant 0 : index
    %1 = vector.load %arg2[%c0_2, %c0_3] : memref<1x128xf32, #tpu.memory_space<vmem>>, vector<1x128xf32>
    %2 = vector.shape_cast %1 : vector<1x128xf32> to vector<1x1x128xf32>
    %3 = vector.broadcast %2 : vector<1x1x128xf32> to vector<2x16x128xf32>
    %4 = arith.mulf %0, %3 : vector<2x16x128xf32>
    %c0_4 = arith.constant 0 : index
    %c0_5 = arith.constant 0 : index
    %5 = vector.load %arg3[%c0_4, %c0_5] : memref<1x128xf32, #tpu.memory_space<vmem>>, vector<1x128xf32>
    %6 = vector.shape_cast %5 : vector<1x128xf32> to vector<1x1x128xf32>
    %7 = vector.broadcast %6 : vector<1x1x128xf32> to vector<2x16x128xf32>
    %8 = arith.addf %4, %7 : vector<2x16x128xf32>
    %cst = arith.constant 0.000000e+00 : f32
    %9 = vector.broadcast %cst : f32 to vector<2x16x128xf32>
    %10 = arith.maximumf %8, %9 : vector<2x16x128xf32>
    %cst_6 = arith.constant 0.000000e+00 : f32
    %11 = vector.broadcast %cst_6 : f32 to vector<2x1x128xf32>
    %c0_7 = arith.constant 0 : index
    %c0_8 = arith.constant 0 : index
    %c0_9 = arith.constant 0 : index
    %12 = vector.load %arg8[%c0_7, %c0_8, %c0_9] : memref<2x18x128xf32, #tpu.memory_space<vmem>>, vector<2x1x128xf32>
    tpu.vector_store %arg8[%c0_7, %c0_8, %c0_9], %11 {strides = array<i32>} : memref<2x18x128xf32, #tpu.memory_space<vmem>>, vector<2x1x128xf32>,
    %cst_10 = arith.constant 0.000000e+00 : f32
    %13 = vector.broadcast %cst_10 : f32 to vector<2x1x128xf32>
    %c0_11 = arith.constant 0 : index
    %c17 = arith.constant 17 : index
    %c0_12 = arith.constant 0 : index
    %14 = vector.load %arg8[%c0_11, %c17, %c0_12] : memref<2x18x128xf32, #tpu.memory_space<vmem>>, vector<2x1x128xf32>
    tpu.vector_store %arg8[%c0_11, %c17, %c0_12], %13 {strides = array<i32>} : memref<2x18x128xf32, #tpu.memory_space<vmem>>, vector<2x1x128xf32>,
    %c0_13 = arith.constant 0 : index
    %c1 = arith.constant 1 : index
    %c0_14 = arith.constant 0 : index
    %15 = vector.load %arg8[%c0_13, %c1, %c0_14] : memref<2x18x128xf32, #tpu.memory_space<vmem>>, vector<2x16x128xf32>
    tpu.vector_store %arg8[%c0_13, %c1, %c0_14], %10 {strides = array<i32>} : memref<2x18x128xf32, #tpu.memory_space<vmem>>, vector<2x16x128xf32>,
    %c0_15 = arith.constant 0 : index
    %c0_16 = arith.constant 0 : index
    %c0_17 = arith.constant 0 : index
    %16 = vector.load %arg8[%c0_15, %c0_16, %c0_17] : memref<2x18x128xf32, #tpu.memory_space<vmem>>, vector<2x16x128xf32>
    %c0_18 = arith.constant 0 : index
    %c1_19 = arith.constant 1 : index
    %c0_20 = arith.constant 0 : index
    %17 = vector.load %arg8[%c0_18, %c1_19, %c0_20] : memref<2x18x128xf32, #tpu.memory_space<vmem>>, vector<2x16x128xf32>
    %c0_21 = arith.constant 0 : index
    %c2 = arith.constant 2 : index
    %c0_22 = arith.constant 0 : index
    %18 = vector.load %arg8[%c0_21, %c2, %c0_22] : memref<2x18x128xf32, #tpu.memory_space<vmem>>, vector<2x16x128xf32>
    %19 = tpu.concatenate %16, %17, %18 in 2 : vector<2x16x128xf32>, vector<2x16x128xf32>, vector<2x16x128xf32> -> vector<2x16x384xf32>
    %20 = vector.shape_cast %19 : vector<2x16x384xf32> to vector<32x384xf32>
    %c0_23 = arith.constant 0 : index
    %c0_24 = arith.constant 0 : index
    %21 = vector.load %arg4[%c0_23, %c0_24] : memref<384x128xf32, #tpu.memory_space<vmem>>, vector<384x128xf32>
    %cst_25 = arith.constant dense<0.000000e+00> : vector<32x128xf32>
    %22 = tpu.matmul %20, %21, %cst_25 {dimension_numbers = #tpu.dot_dimension_numbers<[1], [0], [0], [1], [0, 0, 1, 1], [], []>} : vector<32x384xf32>, vector<384x128xf32>, vector<32x128xf32> -> vector<32x128xf32>
    %c0_26 = arith.constant 0 : index
    %c0_27 = arith.constant 0 : index
    %23 = vector.load %arg5[%c0_26, %c0_27] : memref<1x128xf32, #tpu.memory_space<vmem>>, vector<1x128xf32>
    %24 = vector.broadcast %23 : vector<1x128xf32> to vector<32x128xf32>
    %25 = arith.addf %22, %24 : vector<32x128xf32>
    %cst_28 = arith.constant dense<0.000000e+00> : vector<128xf32>
    %26 = vector.multi_reduction <add>, %25, %cst_28 [0] : vector<32x128xf32> to vector<128xf32>
    %27 = vector.shape_cast %26 : vector<128xf32> to vector<1x128xf32>
    %28 = arith.mulf %25, %25 : vector<32x128xf32>
    %cst_29 = arith.constant dense<0.000000e+00> : vector<128xf32>
    %29 = vector.multi_reduction <add>, %28, %cst_29 [0] : vector<32x128xf32> to vector<128xf32>
    %30 = vector.shape_cast %29 : vector<128xf32> to vector<1x128xf32>
    %31 = tpu.concatenate %27, %30 in 0 : vector<1x128xf32>, vector<1x128xf32> -> vector<2x128xf32>
    %c0_30 = arith.constant 0 : index
    %c0_31 = arith.constant 0 : index
    %c0_32 = arith.constant 0 : index
    %32 = vector.load %arg7[%c0_30, %c0_31, %c0_32] : memref<1x2x128xf32, #tpu.memory_space<vmem>>, vector<1x2x128xf32>
    %33 = vector.shape_cast %32 : vector<1x2x128xf32> to vector<2x128xf32>
    %34 = vector.shape_cast %31 : vector<2x128xf32> to vector<1x2x128xf32>
    tpu.vector_store %arg7[%c0_30, %c0_31, %c0_32], %34 {strides = array<i32>} : memref<1x2x128xf32, #tpu.memory_space<vmem>>, vector<1x2x128xf32>,
    %35 = vector.shape_cast %25 : vector<32x128xf32> to vector<2x16x128xf32>
    %c0_33 = arith.constant 0 : index
    %c0_34 = arith.constant 0 : index
    %c0_35 = arith.constant 0 : index
    %36 = vector.load %arg6[%c0_33, %c0_34, %c0_35] : memref<2x16x128xf32, #tpu.memory_space<vmem>>, vector<2x16x128xf32>
    tpu.vector_store %arg6[%c0_33, %c0_34, %c0_35], %35 {strides = array<i32>} : memref<2x16x128xf32, #tpu.memory_space<vmem>>, vector<2x16x128xf32>,
    return
  }
  func.func @transform_0(%arg0: i32) -> (i32, i32, i32) {
    %c0_i32 = arith.constant 0 : i32
    %c0_i32_0 = arith.constant 0 : i32
    %c0_i32_1 = arith.constant 0 : i32
    return %arg0, %c0_i32, %c0_i32_0 : i32, i32, i32
  }
  func.func @transform_1(%arg0: i32) -> (i32, i32) {
    %c0_i32 = arith.constant 0 : i32
    %c0_i32_0 = arith.constant 0 : i32
    %c0_i32_1 = arith.constant 0 : i32
    return %c0_i32, %c0_i32_0 : i32, i32
  }
  func.func @transform_2(%arg0: i32) -> (i32, i32) {
    %c0_i32 = arith.constant 0 : i32
    %c0_i32_0 = arith.constant 0 : i32
    %c0_i32_1 = arith.constant 0 : i32
    return %c0_i32, %c0_i32_0 : i32, i32
  }
  func.func @transform_3(%arg0: i32) -> (i32, i32) {
    %c0_i32 = arith.constant 0 : i32
    %c0_i32_0 = arith.constant 0 : i32
    %c0_i32_1 = arith.constant 0 : i32
    return %c0_i32, %c0_i32_0 : i32, i32
  }
  func.func @transform_4(%arg0: i32) -> (i32, i32) {
    %c0_i32 = arith.constant 0 : i32
    %c0_i32_0 = arith.constant 0 : i32
    %c0_i32_1 = arith.constant 0 : i32
    return %c0_i32, %c0_i32_0 : i32, i32
  }
  func.func @transform_5(%arg0: i32) -> (i32, i32, i32) {
    %c0_i32 = arith.constant 0 : i32
    %c0_i32_0 = arith.constant 0 : i32
    %c0_i32_1 = arith.constant 0 : i32
    return %arg0, %c0_i32, %c0_i32_0 : i32, i32, i32
  }
  func.func @transform_6(%arg0: i32) -> (i32, i32, i32) {
    %c0_i32 = arith.constant 0 : i32
    %c0_i32_0 = arith.constant 0 : i32
    %c0_i32_1 = arith.constant 0 : i32
    return %arg0, %c0_i32, %c0_i32_0 : i32, i32, i32
  }
}

module attributes {stable_mosaic.version = 11 : i64} {
  func.func @_stage3_kernel(%arg0: i32, %arg1: memref<32x128xf32, #tpu.memory_space<vmem>>, %arg2: memref<1x128xf32, #tpu.memory_space<vmem>>, %arg3: memref<1x128xf32, #tpu.memory_space<vmem>>, %arg4: memref<32x128xf32, #tpu.memory_space<vmem>>, %arg5: memref<1x128xf32, #tpu.memory_space<vmem>>, %arg6: memref<1x128xf32, #tpu.memory_space<vmem>>, %arg7: memref<32x128xf32, #tpu.memory_space<vmem>>) attributes {dimension_semantics = [#tpu.dimension_semantics<parallel>], iteration_bounds = array<i64: 1>, scalar_prefetch = 0 : i64, scratch_operands = 0 : i64, tpu.core_type = #tpu.core_type<tc>, window_params = [{transform_indices = @transform_0, window_bounds = array<i64: 32, 128>}, {pipeline_mode = #tpu.pipeline_mode<synchronous>, transform_indices = @transform_1, window_bounds = array<i64: 1, 128>}, {pipeline_mode = #tpu.pipeline_mode<synchronous>, transform_indices = @transform_2, window_bounds = array<i64: 1, 128>}, {transform_indices = @transform_3, window_bounds = array<i64: 32, 128>}, {pipeline_mode = #tpu.pipeline_mode<synchronous>, transform_indices = @transform_4, window_bounds = array<i64: 1, 128>}, {pipeline_mode = #tpu.pipeline_mode<synchronous>, transform_indices = @transform_5, window_bounds = array<i64: 1, 128>}, {transform_indices = @transform_6, window_bounds = array<i64: 32, 128>}]} {
    %c0 = arith.constant 0 : index
    %c0_0 = arith.constant 0 : index
    %0 = vector.load %arg4[%c0, %c0_0] : memref<32x128xf32, #tpu.memory_space<vmem>>, vector<32x128xf32>
    %c0_1 = arith.constant 0 : index
    %c0_2 = arith.constant 0 : index
    %1 = vector.load %arg5[%c0_1, %c0_2] : memref<1x128xf32, #tpu.memory_space<vmem>>, vector<1x128xf32>
    %2 = vector.broadcast %1 : vector<1x128xf32> to vector<32x128xf32>
    %3 = arith.mulf %0, %2 : vector<32x128xf32>
    %c0_3 = arith.constant 0 : index
    %c0_4 = arith.constant 0 : index
    %4 = vector.load %arg6[%c0_3, %c0_4] : memref<1x128xf32, #tpu.memory_space<vmem>>, vector<1x128xf32>
    %5 = vector.broadcast %4 : vector<1x128xf32> to vector<32x128xf32>
    %6 = arith.addf %3, %5 : vector<32x128xf32>
    %c0_5 = arith.constant 0 : index
    %c0_6 = arith.constant 0 : index
    %7 = vector.load %arg1[%c0_5, %c0_6] : memref<32x128xf32, #tpu.memory_space<vmem>>, vector<32x128xf32>
    %c0_7 = arith.constant 0 : index
    %c0_8 = arith.constant 0 : index
    %8 = vector.load %arg2[%c0_7, %c0_8] : memref<1x128xf32, #tpu.memory_space<vmem>>, vector<1x128xf32>
    %9 = vector.broadcast %8 : vector<1x128xf32> to vector<32x128xf32>
    %10 = arith.mulf %7, %9 : vector<32x128xf32>
    %c0_9 = arith.constant 0 : index
    %c0_10 = arith.constant 0 : index
    %11 = vector.load %arg3[%c0_9, %c0_10] : memref<1x128xf32, #tpu.memory_space<vmem>>, vector<1x128xf32>
    %12 = vector.broadcast %11 : vector<1x128xf32> to vector<32x128xf32>
    %13 = arith.addf %10, %12 : vector<32x128xf32>
    %14 = arith.addf %13, %6 : vector<32x128xf32>
    %cst = arith.constant 0.000000e+00 : f32
    %15 = vector.broadcast %cst : f32 to vector<32x128xf32>
    %16 = arith.maximumf %14, %15 : vector<32x128xf32>
    %c0_11 = arith.constant 0 : index
    %c0_12 = arith.constant 0 : index
    %17 = vector.load %arg7[%c0_11, %c0_12] : memref<32x128xf32, #tpu.memory_space<vmem>>, vector<32x128xf32>
    tpu.vector_store %arg7[%c0_11, %c0_12], %16 {strides = array<i32>} : memref<32x128xf32, #tpu.memory_space<vmem>>, vector<32x128xf32>,
    return
  }
  func.func @transform_0(%arg0: i32) -> (i32, i32) {
    %c0_i32 = arith.constant 0 : i32
    %c0_i32_0 = arith.constant 0 : i32
    return %arg0, %c0_i32 : i32, i32
  }
  func.func @transform_1(%arg0: i32) -> (i32, i32) {
    %c0_i32 = arith.constant 0 : i32
    %c0_i32_0 = arith.constant 0 : i32
    %c0_i32_1 = arith.constant 0 : i32
    return %c0_i32, %c0_i32_0 : i32, i32
  }
  func.func @transform_2(%arg0: i32) -> (i32, i32) {
    %c0_i32 = arith.constant 0 : i32
    %c0_i32_0 = arith.constant 0 : i32
    %c0_i32_1 = arith.constant 0 : i32
    return %c0_i32, %c0_i32_0 : i32, i32
  }
  func.func @transform_3(%arg0: i32) -> (i32, i32) {
    %c0_i32 = arith.constant 0 : i32
    %c0_i32_0 = arith.constant 0 : i32
    return %arg0, %c0_i32 : i32, i32
  }
  func.func @transform_4(%arg0: i32) -> (i32, i32) {
    %c0_i32 = arith.constant 0 : i32
    %c0_i32_0 = arith.constant 0 : i32
    %c0_i32_1 = arith.constant 0 : i32
    return %c0_i32, %c0_i32_0 : i32, i32
  }
  func.func @transform_5(%arg0: i32) -> (i32, i32) {
    %c0_i32 = arith.constant 0 : i32
    %c0_i32_0 = arith.constant 0 : i32
    %c0_i32_1 = arith.constant 0 : i32
    return %c0_i32, %c0_i32_0 : i32, i32
  }
  func.func @transform_6(%arg0: i32) -> (i32, i32) {
    %c0_i32 = arith.constant 0 : i32
    %c0_i32_0 = arith.constant 0 : i32
    return %arg0, %c0_i32 : i32, i32
  }
}

</mosaic_0001>

<bundles_post_ra>
// kernel: tile.43
= control target key start
LH: loop header
LB: loop body
LE: loop exit
PB: predicated region body
PF: predicated region fallthrough
CT: control target
= control target key end

     0   :  { %s28_s0 = inlined_call_operand.vmem [shape: f32[8], index: 0, kind: input, shape index: {}]   ;;  %s29_s1 = inlined_call_operand.vmem [shape: f32[16,8], index: 1, kind: output, shape index: {}]  }
   0x1   :  { %v4_v0 = vld [vmem:[%s28_s0] ss:$0 sm:$0xff] }
   0x2   :  { %5 = vst [vmem:[%s29_s1] sm:$0xff] %v4_v0  ;;  %8 = vst [vmem:[%s29_s1 + $0x8] sm:$0xff] %v4_v0 }

// kernel: tile.44
= control target key start
LH: loop header
LB: loop body
LE: loop exit
PB: predicated region body
PF: predicated region fallthrough
CT: control target
= control target key end

     0   :  { %s131_s10 = smov 120   ;;  %s132_s11 = smov 104   ;;  %vm3_vm0 = vcmask 64512   ;;  %vm9_vm1 = vcmask 1048512   ;;  %vm15_vm2 = vcmask 982912   ;;  %vm21_vm3 = vcmask 917312   ;;  %s207_s0 = inlined_call_operand.vmem [shape: f32[16,8], index: 0, kind: input, shape index: {}]   ;;  %s208_s1 = inlined_call_operand.vmem [shape: f32[1,128], index: 1, kind: output, shape index: {}]  }
   0x1   :  { %v101_v0 = vld [vmem:[%s207_s0 + $0xf] sm:$0x1]   ;;  %v103_v1 = vld [vmem:[%s207_s0 + $0xd] sm:$0x1]   ;;  %v102_v2 = vld [vmem:[%s207_s0 + $0xe] sm:$0x1]  }
   0x2   :  { %7 = vrot.lane.b32.xlu0 %v101_v0, %s131_s10  ;;  %19 = vrot.lane.b32.xlu1 %v103_v1, %s132_s11  ;;  %v104_v3 = vld [vmem:[%s207_s0 + $0xc] sm:$0x1]   ;;  %s133_s16 = smov 112   ;;  %s134_s17 = smov 96   ;;  %v105_v4 = vld [vmem:[%s207_s0 + $0xb] sm:$0x1]  }
   0x3   :  { %v106_v5 = vld [vmem:[%s207_s0 + $0xa] sm:$0x1]   ;;  %v2_v6 = vld [vmem:[%s207_s0] sm:$0x1]   ;;  %s135_s24 = smov 88   ;;  %s136_s25 = smov 80  }
   0x4   :  { %4 = vst.msk [vmem:[#allocation0] sm:$0x1] %vm3_vm0, %v2_v6   ;;  %v107_v7 = vld [vmem:[%s207_s0 + $0x9] sm:$0x1]   ;;  %v108_v8 = vld [vmem:[%s207_s0 + $0x8] sm:$0x1]  }
   0x5   :  { %s137_s30 = smov 72   ;;  %s138_s2 = smov 64   ;;  %v109_v9 = vld [vmem:[%s207_s0 + $0x7] sm:$0x1]   ;;  %v110_v10 = vld [vmem:[%s207_s0 + $0x6] sm:$0x1]  }
   0x6   :  { %13 = vrot.lane.b32.xlu0 %v102_v2, %s133_s16  ;;  %25 = vrot.lane.b32.xlu1 %v104_v3, %s134_s17  ;;  %s139_s7 = smov 56   ;;  %s140_s8 = smov 48   ;;  %v111_v11 = vld [vmem:[%s207_s0 + $0x5] sm:$0x1]   ;;  %v112_v12 = vld [vmem:[%s207_s0 + $0x4] sm:$0x1]  }
   0x7   :  { %s141_s13 = smov 40   ;;  %s142_s14 = smov 32   ;;  %v113_v13 = vld [vmem:[%s207_s0 + $0x3] sm:$0x1]   ;;  %v114_v14 = vld [vmem:[%s207_s0 + $0x2] sm:$0x1]  }
   0x8   :  { %s143_s19 = smov 24   ;;  %s144_s20 = smov 16   ;;  %v115_v15 = vld [vmem:[%s207_s0 + $0x1] sm:$0x1]   ;;  %vm27_vm4 = vcmask 851712   ;;  %vm33_vm5 = vcmask 786112  }
   0x9   :  { %s145_s0 = smov 8   ;;  %vm39_vm6 = vcmask 720512   ;;  %vm45_vm7 = vcmask 654912   ;;  %vm51_vm8 = vcmask 589312   ;;  %vm57_vm9 = vcmask 523712  }
   0xa   :  { %31 = vrot.lane.b32.xlu0 %v105_v4, %s135_s24  ;;  %37 = vrot.lane.b32.xlu1 %v106_v5, %s136_s25  ;;  %vm63_vm10 = vcmask 458112   ;;  %vm69_vm11 = vcmask 392512   ;;  %vm75_vm12 = vcmask 326912   ;;  %vm81_vm13 = vcmask 261312  }
   0xb   :  { %vm87_vm14 = vcmask 195712   ;;  %vm93_vm15 = vcmask 130112  }
   0xe   :  { %43 = vrot.lane.b32.xlu0 %v107_v7, %s137_s30  ;;  %49 = vrot.lane.b32.xlu1 %v108_v8, %s138_s2 }
  0x12   :  { %55 = vrot.lane.b32.xlu0 %v109_v9, %s139_s7  ;;  %61 = vrot.lane.b32.xlu1 %v110_v10, %s140_s8 }
  0x16   :  { %67 = vrot.lane.b32.xlu0 %v111_v11, %s141_s13  ;;  %73 = vrot.lane.b32.xlu1 %v112_v12, %s142_s14 }
  0x1a   :  { %79 = vrot.lane.b32.xlu0 %v113_v13, %s143_s19  ;;  %85 = vrot.lane.b32.xlu1 %v114_v14, %s144_s20 }
  0x1e   :  { %91 = vrot.lane.b32.xlu0 %v115_v15, %s145_s0 }
  0x74   :  { %v8_v16 = vpop.permute.xlu0 %7   ;;  %v20_v17 = vpop.permute.xlu1 %19  }
  0x75   :  { %10 = vst.msk [vmem:[#allocation0] sm:$0x1] %vm9_vm1, %v8_v16  }
  0x78   :  { %v14_v18 = vpop.permute.xlu0 %13   ;;  %v26_v19 = vpop.permute.xlu1 %25  }
  0x79   :  { %16 = vst.msk [vmem:[#allocation0] sm:$0x1] %vm15_vm2, %v14_v18  }
  0x7a   :  { %22 = vst.msk [vmem:[#allocation0] sm:$0x1] %vm21_vm3, %v20_v17  }
  0x7b   :  { %28 = vst.msk [vmem:[#allocation0] sm:$0x1] %vm27_vm4, %v26_v19  }
  0x7c   :  { %v32_v20 = vpop.permute.xlu0 %31   ;;  %v38_v21 = vpop.permute.xlu1 %37  }
  0x7d   :  { %34 = vst.msk [vmem:[#allocation0] sm:$0x1] %vm33_vm5, %v32_v20  }
  0x7e   :  { %40 = vst.msk [vmem:[#allocation0] sm:$0x1] %vm39_vm6, %v38_v21  }
  0x80   :  { %v44_v22 = vpop.permute.xlu0 %43   ;;  %v50_v23 = vpop.permute.xlu1 %49  }
  0x81   :  { %46 = vst.msk [vmem:[#allocation0] sm:$0x1] %vm45_vm7, %v44_v22  }
  0x82   :  { %52 = vst.msk [vmem:[#allocation0] sm:$0x1] %vm51_vm8, %v50_v23  }
  0x84   :  { %v56_v24 = vpop.permute.xlu0 %55   ;;  %v62_v25 = vpop.permute.xlu1 %61  }
  0x85   :  { %58 = vst.msk [vmem:[#allocation0] sm:$0x1] %vm57_vm9, %v56_v24  }
  0x86   :  { %64 = vst.msk [vmem:[#allocation0] sm:$0x1] %vm63_vm10, %v62_v25  }
  0x88   :  { %v68_v26 = vpop.permute.xlu0 %67   ;;  %v74_v27 = vpop.permute.xlu1 %73  }
  0x89   :  { %70 = vst.msk [vmem:[#allocation0] sm:$0x1] %vm69_vm11, %v68_v26  }
  0x8a   :  { %76 = vst.msk [vmem:[#allocation0] sm:$0x1] %vm75_vm12, %v74_v27  }
  0x8c   :  { %v80_v28 = vpop.permute.xlu0 %79   ;;  %v86_v29 = vpop.permute.xlu1 %85  }
  0x8d   :  { %82 = vst.msk [vmem:[#allocation0] sm:$0x1] %vm81_vm13, %v80_v28  }
  0x8e   :  { %88 = vst.msk [vmem:[#allocation0] sm:$0x1] %vm87_vm14, %v86_v29  }
  0x90   :  { %v92_v30 = vpop.permute.xlu0 %91  }
  0x91   :  { %94 = vst.msk [vmem:[#allocation0] sm:$0x1] %vm93_vm15, %v92_v30  }
  0x98   :  { %v98_v31 = vld [vmem:[#allocation0] sm:$0x1] }
  0x99   :  { %100 = vst [vmem:[%s208_s1] sm:$0x1] %v98_v31 }

// kernel: res_block2_forward.3
= control target key start
LH: loop header
LB: loop body
LE: loop exit
PB: predicated region body
PF: predicated region fallthrough
CT: control target
= control target key end

     0   :  { %vm49_vm0 = vcmask 523264   ;;  %v461_v2 = vmov 0.0|0.0   ;;  %s462_s28 = smov 64   ;;  %vm204_vm1 = vcmask 1040384   ;;  %s702_s0 = inlined_call_operand.vmem [shape: f32[2,18,64], index: 0, kind: input, shape index: {}]   ;;  %s703_s1 = inlined_call_operand.vmem [shape: f32[192,128], index: 1, kind: input, shape index: {}]   ;;  %s704_s3 = inlined_call_operand.vmem [shape: f32[64,128], index: 3, kind: input, shape index: {}]   ;;  %s705_s6 = inlined_call_operand.vmem [shape: f32[2,16,128], index: 6, kind: output, shape index: {2}]   ;;  %s706_s7 = inlined_call_operand.vmem [shape: f32[1,2,128], index: 7, kind: output, shape index: {3}]   ;;  %s707_s2 = inlined_call_operand.vmem [shape: f32[1,128], index: 2, kind: input, shape index: {}]   ;;  %s708_s4 = inlined_call_operand.vmem [shape: f32[2,16,128], index: 4, kind: output, shape index: {0}]   ;;  %s709_s5 = inlined_call_operand.vmem [shape: f32[1,2,128], index: 5, kind: output, shape index: {1}]  }
   0x1   :  { %v25_v0 = vld [vmem:[%s702_s0 + $0x1] sm:$0xff]  ;;  %v509_v1 = vld [vmem:[%s702_s0 + $0x19] sm:$0xff]  ;;  %407 = vmatprep.subr.bf16.mxu0 %v461_v2  ;;  %v26_v4 = vld [vmem:[%s702_s0 + $0x9] sm:$0xff] }
   0x2   :  { %37 = vrot.lane.b32.xlu0 %v25_v0, %s462_s28  ;;  %41 = vrot.lane.b32.xlu1 %v509_v1, %s462_s28  ;;  %v54_v3 = vld [vmem:[%s703_s1] sm:$0xff]  ;;  %v55_v6 = vld [vmem:[%s703_s1 + $0x8] sm:$0xff] }
   0x3   :  { %v522_v5 = vld [vmem:[%s702_s0 + $0x21] sm:$0xff]  ;;  %401 = vmatprep.mubr.msk.f32.mxu1 %vm49_vm0, %v25_v0  ;;  %v408_v7 = vpack.c.bf16 %v55_v6, %v54_v3  ;;  %v56_v8 = vld [vmem:[%s703_s1 + $0x10] sm:$0xff]  ;;  %v57_v9 = vld [vmem:[%s703_s1 + $0x18] sm:$0xff] }
   0x4   :  { %v411_v10 = vpack.c.bf16 %v57_v9, %v56_v8  ;;  %v215_v11 = vld [vmem:[%s704_s3] sm:$0xff]  ;;  %v59_v13 = vld [vmem:[%s703_s1 + $0x28] sm:$0xff]  ;;  %v217_v16 = vld [vmem:[%s704_s3 + $0x10] sm:$0xff] }
   0x5   :  { %409 = vmatpush1.bf16.msra.mxu0 %v408_v7  ;;  %v58_v12 = vld [vmem:[%s703_s1 + $0x20] sm:$0xff]  ;;  %v216_v14 = vld [vmem:[%s704_s3 + $0x8] sm:$0xff]  ;;  %v218_v17 = vld [vmem:[%s704_s3 + $0x18] sm:$0xff] }
   0x6   :  { %39 = vrot.lane.b32.xlu0 %v26_v4, %s462_s28  ;;  %43 = vrot.lane.b32.xlu1 %v522_v5, %s462_s28  ;;  %v443_v15 = vpack.c.bf16 %v216_v14, %v215_v11  ;;  %v447_v18 = vpack.c.bf16 %v218_v17, %v217_v16  ;;  %v219_v19 = vld [vmem:[%s704_s3 + $0x20] sm:$0xff]  ;;  %v220_v20 = vld [vmem:[%s704_s3 + $0x28] sm:$0xff]  ;;  %v414_v21 = vpack.c.bf16 %v59_v13, %v58_v12 }
   0x7   :  { %410 = vmatprep.subr.bf16.mxu0 %v461_v2  ;;  %v60_v22 = vld [vmem:[%s703_s1 + $0x30] sm:$0xff]  ;;  %v61_v23 = vld [vmem:[%s703_s1 + $0x38] sm:$0xff]  ;;  %v451_v24 = vpack.c.bf16 %v220_v20, %v219_v19  ;;  %v29_v25 = vld [vmem:[%s702_s0 + $0x2] sm:$0xff] }
   0x8   :  { %444 = vmatprep.subr.bf16.mxu1 %v443_v15  ;;  %v221_v26 = vld [vmem:[%s704_s3 + $0x30] sm:$0xff]  ;;  %v222_v27 = vld [vmem:[%s704_s3 + $0x38] sm:$0xff]  ;;  %365 = vmatprep.mubr.msk.f32.mxu0 %vm49_vm0, %v29_v25  ;;  %v417_v28 = vpack.c.bf16 %v61_v23, %v60_v22  ;;  %v62_v29 = vld [vmem:[%s703_s1 + $0x40] sm:$0xff] }
   0x9   :  { %412 = vmatpush1.bf16.msra.mxu0 %v411_v10  ;;  %446 = vmatpush3.bf16.msra.mxu1 %v443_v15  ;;  %v63_v30 = vld [vmem:[%s703_s1 + $0x48] sm:$0xff]  ;;  %v455_v31 = vpack.c.bf16 %v222_v27, %v221_v26  ;;  %v64_v33 = vld [vmem:[%s703_s1 + $0x50] sm:$0xff]  ;;  %v65_v34 = vld [vmem:[%s703_s1 + $0x58] sm:$0xff] }
   0xa   :  { %413 = vmatprep.subr.bf16.mxu0 %v461_v2  ;;  %448 = vmatprep.subr.bf16.mxu1 %v447_v18  ;;  %v420_v32 = vpack.c.bf16 %v63_v30, %v62_v29  ;;  %v423_v35 = vpack.c.bf16 %v65_v34, %v64_v33  ;;  %v66_v36 = vld [vmem:[%s703_s1 + $0x60] sm:$0xff]  ;;  %v67_v37 = vld [vmem:[%s703_s1 + $0x68] sm:$0xff]  ;;  %v68_v39 = vld [vmem:[%s703_s1 + $0x70] sm:$0xff] }
   0xb   :  { %v426_v38 = vpack.c.bf16 %v67_v37, %v66_v36  ;;  %v69_v40 = vld [vmem:[%s703_s1 + $0x78] sm:$0xff]  ;;  %v70_v42 = vld [vmem:[%s703_s1 + $0x80] sm:$0xff]  ;;  %v71_v43 = vld [vmem:[%s703_s1 + $0x88] sm:$0xff] }
   0xc   :  { %v429_v41 = vpack.c.bf16 %v69_v40, %v68_v39  ;;  %v432_v44 = vpack.c.bf16 %v71_v43, %v70_v42  ;;  %v72_v45 = vld [vmem:[%s703_s1 + $0x90] sm:$0xff]  ;;  %v73_v46 = vld [vmem:[%s703_s1 + $0x98] sm:$0xff]  ;;  %v74_v48 = vld [vmem:[%s703_s1 + $0xa0] sm:$0xff] }
   0xd   :  { %415 = vmatpush1.bf16.msra.mxu0 %v414_v21  ;;  %450 = vmatpush3.bf16.msra.mxu1 %v447_v18  ;;  %v435_v47 = vpack.c.bf16 %v73_v46, %v72_v45  ;;  %v75_v49 = vld [vmem:[%s703_s1 + $0xa8] sm:$0xff]  ;;  %v76_v51 = vld [vmem:[%s703_s1 + $0xb0] sm:$0xff]  ;;  %v77_v52 = vld [vmem:[%s703_s1 + $0xb8] sm:$0xff] }
   0xe   :  { %416 = vmatprep.subr.bf16.mxu0 %v461_v2  ;;  %452 = vmatprep.subr.bf16.mxu1 %v451_v24  ;;  %v438_v50 = vpack.c.bf16 %v75_v49, %v74_v48  ;;  %v441_v53 = vpack.c.bf16 %v77_v52, %v76_v51  ;;  %v21_v54 = vld [vmem:[%s702_s0] sm:$0xff]  ;;  %v30_v56 = vld [vmem:[%s702_s0 + $0xa] sm:$0xff]  ;;  %v23_v62 = vld [vmem:[%s702_s0 + $0x18] sm:$0xff] }
   0xf   :  { %v22_v58 = vld [vmem:[%s702_s0 + $0x8] sm:$0xff]  ;;  %v31_v61 = vld [vmem:[%s702_s0 + $0x1a] sm:$0xff] }
  0x10   :  { %v24_v3 = vld [vmem:[%s702_s0 + $0x20] sm:$0xff] }
  0x11   :  { %418 = vmatpush1.bf16.msra.mxu0 %v417_v28  ;;  %454 = vmatpush3.bf16.msra.mxu1 %v451_v24 }
  0x12   :  { %419 = vmatprep.subr.bf16.mxu0 %v461_v2  ;;  %456 = vmatprep.subr.bf16.mxu1 %v455_v31 }
  0x15   :  { %421 = vmatpush1.bf16.msra.mxu0 %v420_v32  ;;  %458 = vmatpush3.bf16.msra.mxu1 %v455_v31  ;;  %v364_v32 = vld [vmem:[%s707_s2] ss:$0 sm:$0xff] }
  0x16   :  { %422 = vmatprep.subr.bf16.mxu0 %v461_v2 }
  0x18   :  { %402 = vmatmul.mubr.msk.f32.vlgmr.msra.gmra.mrb[0].mxu1 %vm49_vm0, %v26_v4 }
  0x19   :  { %424 = vmatpush1.bf16.msra.mxu0 %v423_v35  ;;  %404 = vmatprep.mubr.msk.f32.mxu1 %vm49_vm0, %v509_v1 }
  0x1a   :  { %425 = vmatprep.subr.bf16.mxu0 %v461_v2 }
  0x1c   :  { %405 = vmatmul.mubr.msk.f32.gmra.mrb[2].mxu1 %vm49_vm0, %v522_v5 }
  0x1d   :  { %427 = vmatpush1.bf16.msra.mxu0 %v426_v38 }
  0x1e   :  { %428 = vmatprep.subr.bf16.mxu0 %v461_v2 }
  0x21   :  { %430 = vmatpush1.bf16.msra.mxu0 %v429_v41 }
  0x22   :  { %431 = vmatprep.subr.bf16.mxu0 %v461_v2 }
  0x25   :  { %433 = vmatpush1.bf16.msra.mxu0 %v432_v44 }
  0x26   :  { %434 = vmatprep.subr.bf16.mxu0 %v461_v2 }
  0x29   :  { %436 = vmatpush1.bf16.msra.mxu0 %v435_v47 }
  0x2a   :  { %437 = vmatprep.subr.bf16.mxu0 %v461_v2 }
  0x2d   :  { %439 = vmatpush1.bf16.msra.mxu0 %v438_v50 }
  0x2e   :  { %440 = vmatprep.subr.bf16.mxu0 %v461_v2  ;;  %v32_v2 = vld [vmem:[%s702_s0 + $0x22] sm:$0xff] }
  0x31   :  { %442 = vmatpush1.bf16.msra.mxu0 %v441_v53 }
  0x74   :  { %v38_v55 = vpop.permute.xlu0 %37  ;;  %v42_v59 = vpop.permute.xlu1 %41 }
  0x75   :  { %v50_v57 = vsel %vm49_vm0, %v21_v54, %v38_v55  ;;  %v52_v0 = vsel %vm49_vm0, %v23_v62, %v42_v59 }
  0x76   :  { %162 = vmatmul.mubr.f32.vlgmr.msra.gmra.mrb[0].mxu0 %v50_v57 }
  0x77   :  { %366 = vmatprep.mubr.msk.f32.mxu0 %vm49_vm0, %v30_v56 }
  0x78   :  { %v40_v60 = vpop.permute.xlu0 %39  ;;  %v44_v1 = vpop.permute.xlu1 %43 }
  0x79   :  { %v51_v63 = vsel %vm49_vm0, %v22_v58, %v40_v60  ;;  %v53_v4 = vsel %vm49_vm0, %v24_v3, %v44_v1 }
  0x7a   :  { %167 = vmatmul.mubr.f32.gmra.mrb[2].mxu0 %v51_v63 }
  0x7b   :  { %367 = vmatprep.mubr.msk.f32.mxu0 %vm49_vm0, %v31_v61 }
  0x7e   :  { %172 = vmatmul.mubr.f32.gmra.mrb[4].mxu0 %v52_v0 }
  0x7f   :  { %368 = vmatprep.mubr.msk.f32.mxu0 %vm49_vm0, %v32_v2 }
  0x82   :  { %177 = vmatmul.mubr.f32.gmra.mrb[6].mxu0 %v53_v4 }
  0xeb   :  { %v403_v5 = vpop.f32.mrb[0].mxu1 }
  0xec   :  { %v330_v6 = vmul.f32 %v403_v5, %v403_v5  ;;  %345 = vst [vmem:[%s705_s6 + $0x8] sm:$0xff] %v403_v5  ;;  %v301_v7 = vpop.f32.mrb[1].mxu1 }
  0xed   :  { %v320_v8 = vadd.f32 %v403_v5, %v301_v7  ;;  %v329_v9 = vmul.f32 %v301_v7, %v301_v7  ;;  %344 = vst [vmem:[%s705_s6] sm:$0xff] %v301_v7 }
  0xef   :  { %v333_v10 = vadd.f32 %v330_v6, %v329_v9  ;;  %v406_v11 = vpop.f32.mrb[2].mxu1 }
  0xf0   :  { %347 = vst [vmem:[%s705_s6 + $0x18] sm:$0xff] %v406_v11  ;;  %v311_v12 = vpop.f32.mrb[3].mxu1  ;;  %v332_v13 = vmul.f32 %v406_v11, %v406_v11 }
  0xf1   :  { %v321_v14 = vadd.f32 %v320_v8, %v311_v12  ;;  %v331_v15 = vmul.f32 %v311_v12, %v311_v12  ;;  %346 = vst [vmem:[%s705_s6 + $0x10] sm:$0xff] %v311_v12 }
  0xf3   :  { %v322_v16 = vadd.f32 %v406_v11, %v321_v14  ;;  %v334_v17 = vadd.f32 %v333_v10, %v331_v15 }
  0xf5   :  { %v323_v18 = vrot.slane %v322_v16, 4  ;;  %v335_v19 = vadd.f32 %v334_v17, %v332_v13 }
  0xf7   :  { %v324_v20 = vadd.f32 %v323_v18, %v322_v16  ;;  %v336_v21 = vrot.slane %v335_v19, 4 }
  0xf9   :  { %v325_v22 = vrot.slane %v324_v20, 2  ;;  %v337_v23 = vadd.f32 %v336_v21, %v335_v19 }
  0xfb   :  { %v326_v24 = vadd.f32 %v325_v22, %v324_v20  ;;  %v338_v25 = vrot.slane %v337_v23, 2 }
  0xfd   :  { %v327_v26 = vrot.slane %v326_v24, 1  ;;  %v339_v27 = vadd.f32 %v338_v25, %v337_v23 }
  0xff   :  { %v328_v28 = vadd.f32 %v327_v26, %v326_v24  ;;  %v340_v29 = vrot.slane %v339_v27, 1 }
 0x101   :  { %v341_v30 = vadd.f32 %v340_v29, %v339_v27 }
 0x103   :  { %v342_v31 = vsel %vm204_vm1, %v328_v28, %v341_v30 }
 0x104   :  { %343 = vst [vmem:[%s706_s7] sm:$0x3] %v342_v31 }
 0x149   :  { %v163_v33 = vpop.f32.mrb[0].mxu0 }
 0x14a   :  { %v164_v34 = vadd.f32 %v364_v32, %v163_v33  ;;  %v165_v35 = vpop.f32.mrb[1].mxu0 }
 0x14c   :  { %207 = vst [vmem:[%s708_s4] sm:$0xff] %v164_v34  ;;  %v191_v39 = vmul.f32 %v164_v34, %v164_v34 }
 0x14d   :  { %v168_v36 = vpop.f32.mrb[2].mxu0 }
 0x14e   :  { %v169_v37 = vadd.f32 %v364_v32, %v168_v36  ;;  %v170_v38 = vpop.f32.mrb[3].mxu0 }
 0x150   :  { %v182_v40 = vadd.f32 %v169_v37, %v164_v34  ;;  %v192_v41 = vmul.f32 %v169_v37, %v169_v37  ;;  %208 = vst [vmem:[%s708_s4 + $0x8] sm:$0xff] %v169_v37 }
 0x151   :  { %v173_v42 = vpop.f32.mrb[4].mxu0 }
 0x152   :  { %v195_v43 = vadd.f32 %v192_v41, %v191_v39  ;;  %v174_v44 = vadd.f32 %v364_v32, %v173_v42  ;;  %v175_v45 = vpop.f32.mrb[5].mxu0 }
 0x154   :  { %v183_v46 = vadd.f32 %v182_v40, %v174_v44  ;;  %v193_v47 = vmul.f32 %v174_v44, %v174_v44  ;;  %209 = vst [vmem:[%s708_s4 + $0x10] sm:$0xff] %v174_v44 }
 0x155   :  { %v178_v48 = vpop.f32.mrb[6].mxu0 }
 0x156   :  { %v196_v49 = vadd.f32 %v195_v43, %v193_v47  ;;  %v179_v50 = vadd.f32 %v364_v32, %v178_v48  ;;  %v180_v51 = vpop.f32.mrb[7].mxu0 }
 0x158   :  { %v184_v52 = vadd.f32 %v183_v46, %v179_v50  ;;  %v194_v53 = vmul.f32 %v179_v50, %v179_v50  ;;  %210 = vst [vmem:[%s708_s4 + $0x18] sm:$0xff] %v179_v50 }
 0x15a   :  { %v185_v54 = vrot.slane %v184_v52, 4  ;;  %v197_v55 = vadd.f32 %v196_v49, %v194_v53 }
 0x15c   :  { %v186_v56 = vadd.f32 %v185_v54, %v184_v52  ;;  %v198_v57 = vrot.slane %v197_v55, 4 }
 0x15e   :  { %v187_v58 = vrot.slane %v186_v56, 2  ;;  %v199_v59 = vadd.f32 %v198_v57, %v197_v55 }
 0x160   :  { %v188_v60 = vadd.f32 %v187_v58, %v186_v56  ;;  %v200_v61 = vrot.slane %v199_v59, 2 }
 0x162   :  { %v189_v62 = vrot.slane %v188_v60, 1  ;;  %v201_v63 = vadd.f32 %v200_v61, %v199_v59 }
 0x164   :  { %v202_v0 = vrot.slane %v201_v63, 1  ;;  %v190_v1 = vadd.f32 %v189_v62, %v188_v60 }
 0x166   :  { %v203_v2 = vadd.f32 %v202_v0, %v201_v63 }
 0x168   :  { %v205_v3 = vsel %vm204_vm1, %v190_v1, %v203_v2 }
 0x169   :  { %206 = vst [vmem:[%s709_s5] sm:$0x3] %v205_v3 }

// kernel: res_block2_forward.4
= control target key start
LH: loop header
LB: loop body
LE: loop exit
PB: predicated region body
PF: predicated region fallthrough
CT: control target
= control target key end

     0   :  { %v504_v3 = vmov 0.0   ;;  %vm319_vm0 = vcmask 1040384   ;;  %s720_s3 = inlined_call_operand.vmem [shape: f32[384,128], index: 3, kind: input, shape index: {}]   ;;  %s721_s0 = inlined_call_operand.vmem [shape: f32[2,16,128], index: 0, kind: input, shape index: {}]   ;;  %s722_s1 = inlined_call_operand.vmem [shape: f32[1,128], index: 1, kind: input, shape index: {}]   ;;  %s723_s2 = inlined_call_operand.vmem [shape: f32[1,128], index: 2, kind: input, shape index: {}]   ;;  %s724_s4 = inlined_call_operand.vmem [shape: f32[1,128], index: 4, kind: input, shape index: {}]   ;;  %s725_s5 = inlined_call_operand.vmem [shape: f32[2,16,128], index: 5, kind: output, shape index: {0}]   ;;  %s726_s6 = inlined_call_operand.vmem [shape: f32[1,2,128], index: 6, kind: output, shape index: {1}]  }
   0x1   :  { %v88_v0 = vld [vmem:[%s720_s3 + $0x80] sm:$0xff]  ;;  %v89_v1 = vld [vmem:[%s720_s3 + $0x88] sm:$0xff]  ;;  %52 = vst [vmem:[#allocation2] sm:$0x1] %v504_v3  ;;  %53 = vst [vmem:[#allocation2 + $0x18] sm:$0x1] %v504_v3 }
   0x2   :  { %v72_v2 = vld [vmem:[%s720_s3] sm:$0xff]  ;;  %54 = vst [vmem:[#allocation2 + $0x11] sm:$0x1] %v504_v3  ;;  %55 = vst [vmem:[#allocation2 + $0x29] sm:$0x1] %v504_v3  ;;  %v439_v4 = vpack.c.bf16 %v89_v1, %v88_v0  ;;  %v73_v5 = vld [vmem:[%s720_s3 + $0x8] sm:$0xff] }
   0x3   :  { %v90_v6 = vld [vmem:[%s720_s3 + $0x90] sm:$0xff]  ;;  %v91_v7 = vld [vmem:[%s720_s3 + $0x98] sm:$0xff]  ;;  %v441_v8 = vpack.c.bf16 %v73_v5, %v72_v2  ;;  %v104_v10 = vld [vmem:[%s720_s3 + $0x100] sm:$0xff] }
   0x4   :  { %v443_v9 = vpack.c.bf16 %v91_v7, %v90_v6  ;;  %v105_v11 = vld [vmem:[%s720_s3 + $0x108] sm:$0xff]  ;;  %v74_v12 = vld [vmem:[%s720_s3 + $0x10] sm:$0xff]  ;;  %440 = vmatprep.subr.bf16.mxu0 %v439_v4  ;;  %v75_v14 = vld [vmem:[%s720_s3 + $0x18] sm:$0xff] }
   0x5   :  { %v471_v13 = vpack.c.bf16 %v105_v11, %v104_v10  ;;  %v92_v15 = vld [vmem:[%s720_s3 + $0xa0] sm:$0xff]  ;;  %v93_v16 = vld [vmem:[%s720_s3 + $0xa8] sm:$0xff]  ;;  %442 = vmatpush3.bf16.msra.mxu0 %v441_v8  ;;  %v445_v17 = vpack.c.bf16 %v75_v14, %v74_v12  ;;  %v106_v18 = vld [vmem:[%s720_s3 + $0x110] sm:$0xff] }
   0x6   :  { %v107_v19 = vld [vmem:[%s720_s3 + $0x118] sm:$0xff]  ;;  %444 = vmatprep.subr.bf16.mxu0 %v443_v9  ;;  %v447_v20 = vpack.c.bf16 %v93_v16, %v92_v15  ;;  %v76_v22 = vld [vmem:[%s720_s3 + $0x20] sm:$0xff]  ;;  %v77_v23 = vld [vmem:[%s720_s3 + $0x28] sm:$0xff] }
   0x7   :  { %472 = vmatprep.subr.bf16.mxu1 %v471_v13  ;;  %v475_v21 = vpack.c.bf16 %v107_v19, %v106_v18  ;;  %v94_v24 = vld [vmem:[%s720_s3 + $0xb0] sm:$0xff]  ;;  %v95_v25 = vld [vmem:[%s720_s3 + $0xb8] sm:$0xff]  ;;  %v108_v26 = vld [vmem:[%s720_s3 + $0x120] sm:$0xff]  ;;  %v449_v29 = vpack.c.bf16 %v77_v23, %v76_v22 }
   0x8   :  { %474 = vmatpush3.bf16.msra.mxu1 %v471_v13  ;;  %v109_v27 = vld [vmem:[%s720_s3 + $0x128] sm:$0xff]  ;;  %v110_v30 = vld [vmem:[%s720_s3 + $0x130] sm:$0xff]  ;;  %v111_v31 = vld [vmem:[%s720_s3 + $0x138] sm:$0xff]  ;;  %v451_v32 = vpack.c.bf16 %v95_v25, %v94_v24 }
   0x9   :  { %476 = vmatprep.subr.bf16.mxu1 %v475_v21  ;;  %v479_v28 = vpack.c.bf16 %v109_v27, %v108_v26  ;;  %446 = vmatpush3.bf16.msra.mxu0 %v445_v17  ;;  %v78_v33 = vld [vmem:[%s720_s3 + $0x30] sm:$0xff]  ;;  %v79_v34 = vld [vmem:[%s720_s3 + $0x38] sm:$0xff]  ;;  %v96_v35 = vld [vmem:[%s720_s3 + $0xc0] sm:$0xff]  ;;  %v483_v37 = vpack.c.bf16 %v111_v31, %v110_v30 }
   0xa   :  { %448 = vmatprep.subr.bf16.mxu0 %v447_v20  ;;  %v97_v36 = vld [vmem:[%s720_s3 + $0xc8] sm:$0xff]  ;;  %v453_v38 = vpack.c.bf16 %v79_v34, %v78_v33  ;;  %v112_v39 = vld [vmem:[%s720_s3 + $0x140] sm:$0xff]  ;;  %v98_v44 = vld [vmem:[%s720_s3 + $0xd0] sm:$0xff] }
   0xb   :  { %v113_v40 = vld [vmem:[%s720_s3 + $0x148] sm:$0xff]  ;;  %v455_v41 = vpack.c.bf16 %v97_v36, %v96_v35  ;;  %v80_v42 = vld [vmem:[%s720_s3 + $0x40] sm:$0xff]  ;;  %v99_v45 = vld [vmem:[%s720_s3 + $0xd8] sm:$0xff] }
   0xc   :  { %478 = vmatpush3.bf16.msra.mxu1 %v475_v21  ;;  %v81_v43 = vld [vmem:[%s720_s3 + $0x48] sm:$0xff]  ;;  %v82_v46 = vld [vmem:[%s720_s3 + $0x50] sm:$0xff]  ;;  %v487_v47 = vpack.c.bf16 %v113_v40, %v112_v39  ;;  %v83_v48 = vld [vmem:[%s720_s3 + $0x58] sm:$0xff]  ;;  %v459_v56 = vpack.c.bf16 %v99_v45, %v98_v44 }
   0xd   :  { %480 = vmatprep.subr.bf16.mxu1 %v479_v28  ;;  %450 = vmatpush3.bf16.msra.mxu0 %v449_v29  ;;  %v22_v49 = vld [vmem:[%s721_s0] sm:$0xff]  ;;  %v457_v51 = vpack.c.bf16 %v81_v43, %v80_v42  ;;  %v114_v52 = vld [vmem:[%s720_s3 + $0x150] sm:$0xff]  ;;  %v115_v53 = vld [vmem:[%s720_s3 + $0x158] sm:$0xff]  ;;  %v461_v2 = vpack.c.bf16 %v83_v48, %v82_v46 }
   0xe   :  { %452 = vmatprep.subr.bf16.mxu0 %v451_v32  ;;  %v334_v50 = vld [vmem:[%s722_s1] ss:$0 sm:$0xff]  ;;  %v23_v57 = vld [vmem:[%s721_s0 + $0x8] sm:$0xff]  ;;  %v24_v58 = vld [vmem:[%s721_s0 + $0x10] sm:$0xff]  ;;  %v491_v3 = vpack.c.bf16 %v115_v53, %v114_v52 }
   0xf   :  { %v33_v54 = vmul.f32 %v334_v50, %v22_v49  ;;  %v335_v55 = vld [vmem:[%s723_s2] ss:$0 sm:$0xff]  ;;  %v25_v59 = vld [vmem:[%s721_s0 + $0x18] sm:$0xff]  ;;  %v101_v61 = vld [vmem:[%s720_s3 + $0xe8] sm:$0xff]  ;;  %v34_v63 = vmul.f32 %v334_v50, %v23_v57  ;;  %v35_v0 = vmul.f32 %v334_v50, %v24_v58 }
  0x10   :  { %482 = vmatpush3.bf16.msra.mxu1 %v479_v28  ;;  %v100_v60 = vld [vmem:[%s720_s3 + $0xe0] sm:$0xff]  ;;  %v36_v1 = vmul.f32 %v334_v50, %v25_v59  ;;  %v117_v5 = vld [vmem:[%s720_s3 + $0x168] sm:$0xff]  ;;  %v102_v13 = vld [vmem:[%s720_s3 + $0xf0] sm:$0xff] }
  0x11   :  { %484 = vmatprep.subr.bf16.mxu1 %v483_v37  ;;  %454 = vmatpush3.bf16.msra.mxu0 %v453_v38  ;;  %v44_v62 = vadd.f32 %v335_v55, %v33_v54  ;;  %v116_v4 = vld [vmem:[%s720_s3 + $0x160] sm:$0xff]  ;;  %v45_v7 = vadd.f32 %v335_v55, %v34_v63  ;;  %v46_v8 = vadd.f32 %v335_v55, %v35_v0  ;;  %v85_v12 = vld [vmem:[%s720_s3 + $0x68] sm:$0xff]  ;;  %v103_v14 = vld [vmem:[%s720_s3 + $0xf8] sm:$0xff] }
  0x12   :  { %456 = vmatprep.subr.bf16.mxu0 %v455_v41  ;;  %v47_v9 = vadd.f32 %v335_v55, %v36_v1  ;;  %v463_v10 = vpack.c.bf16 %v101_v61, %v100_v60  ;;  %v84_v11 = vld [vmem:[%s720_s3 + $0x60] sm:$0xff]  ;;  %v495_v18 = vpack.c.bf16 %v117_v5, %v116_v4  ;;  %v118_v20 = vld [vmem:[%s720_s3 + $0x170] sm:$0xff]  ;;  %v119_v21 = vld [vmem:[%s720_s3 + $0x178] sm:$0xff]  ;;  %v467_v22 = vpack.c.bf16 %v103_v14, %v102_v13 }
  0x13   :  { %v48_v6 = vmax.f32 %v44_v62, 0.0  ;;  %v49_v15 = vmax.f32 %v45_v7, 0.0  ;;  %v50_v16 = vmax.f32 %v46_v8, 0.0  ;;  %v465_v19 = vpack.c.bf16 %v85_v12, %v84_v11  ;;  %v86_v23 = vld [vmem:[%s720_s3 + $0x70] sm:$0xff]  ;;  %v87_v24 = vld [vmem:[%s720_s3 + $0x78] sm:$0xff] }
  0x14   :  { %486 = vmatpush3.bf16.msra.mxu1 %v483_v37  ;;  %v51_v17 = vmax.f32 %v47_v9, 0.0  ;;  %v499_v25 = vpack.c.bf16 %v119_v21, %v118_v20  ;;  %v469_v26 = vpack.c.bf16 %v87_v24, %v86_v23  ;;  %v336_v37 = vld [vmem:[%s724_s4] ss:$0 sm:$0xff] }
  0x15   :  { %488 = vmatprep.subr.bf16.mxu1 %v487_v47  ;;  %458 = vmatpush3.bf16.msra.mxu0 %v457_v51  ;;  %56 = vst [vmem:[#allocation2 + $0x1] sm:$0xff] %v48_v6  ;;  %57 = vst [vmem:[#allocation2 + $0x9] sm:$0xff] %v49_v15 }
  0x16   :  { %460 = vmatprep.subr.bf16.mxu0 %v459_v56  ;;  %191 = vmatprep.mubr.f32.mxu0 %v48_v6  ;;  %58 = vst [vmem:[#allocation2 + $0x19] sm:$0xff] %v50_v16  ;;  %59 = vst [vmem:[#allocation2 + $0x21] sm:$0xff] %v51_v17 }
  0x18   :  { %490 = vmatpush3.bf16.msra.mxu1 %v487_v47 }
  0x19   :  { %492 = vmatprep.subr.bf16.mxu1 %v491_v3  ;;  %462 = vmatpush3.bf16.msra.mxu0 %v461_v2 }
  0x1a   :  { %464 = vmatprep.subr.bf16.mxu0 %v463_v10 }
  0x1c   :  { %494 = vmatpush3.bf16.msra.mxu1 %v491_v3  ;;  %v68_v27 = vld [vmem:[#allocation2 + $0x2] sm:$0xff]  ;;  %v69_v29 = vld [vmem:[#allocation2 + $0xa] sm:$0xff] }
  0x1d   :  { %496 = vmatprep.subr.bf16.mxu1 %v495_v18  ;;  %466 = vmatpush3.bf16.msra.mxu0 %v465_v19  ;;  %v60_v28 = vld [vmem:[#allocation2] sm:$0xff]  ;;  %v61_v31 = vld [vmem:[#allocation2 + $0x8] sm:$0xff]  ;;  %v62_v33 = vld [vmem:[#allocation2 + $0x18] sm:$0xff] }
  0x1e   :  { %468 = vmatprep.subr.bf16.mxu0 %v467_v22  ;;  %433 = vmatprep.mubr.f32.mxu1 %v68_v27  ;;  %v70_v30 = vld [vmem:[#allocation2 + $0x1a] sm:$0xff]  ;;  %v71_v32 = vld [vmem:[#allocation2 + $0x22] sm:$0xff] }
  0x1f   :  { %v63_v34 = vld [vmem:[#allocation2 + $0x20] sm:$0xff] }
  0x20   :  { %498 = vmatpush3.bf16.msra.mxu1 %v495_v18 }
  0x21   :  { %500 = vmatprep.subr.bf16.mxu1 %v499_v25  ;;  %470 = vmatpush3.bf16.msra.mxu0 %v469_v26 }
  0x24   :  { %502 = vmatpush3.bf16.msra.mxu1 %v499_v25  ;;  %192 = vmatmul.mubr.f32.vlgmr.msra.gmra.mrb[0].mxu0 %v60_v28 }
  0x25   :  { %196 = vmatprep.mubr.f32.mxu0 %v49_v15 }
  0x27   :  { %434 = vmatmul.mubr.f32.vlgmr.msra.gmra.mrb[0].mxu1 %v69_v29 }
  0x28   :  { %436 = vmatprep.mubr.f32.mxu1 %v70_v30  ;;  %197 = vmatmul.mubr.f32.gmra.mrb[2].mxu0 %v61_v31 }
  0x29   :  { %201 = vmatprep.mubr.f32.mxu0 %v50_v16 }
  0x2b   :  { %437 = vmatmul.mubr.f32.gmra.mrb[2].mxu1 %v71_v32 }
  0x2c   :  { %202 = vmatmul.mubr.f32.gmra.mrb[4].mxu0 %v62_v33 }
  0x2d   :  { %206 = vmatprep.mubr.f32.mxu0 %v51_v17 }
  0x30   :  { %207 = vmatmul.mubr.f32.gmra.mrb[6].mxu0 %v63_v34 }
  0xf7   :  { %v369_v35 = vpop.f32.mrb[0].mxu0 }
  0xf8   :  { %v370_v36 = vpop.f32.mrb[1].mxu0 }
  0xf9   :  { %v371_v38 = vadd.f32 %v370_v36, %v369_v35 }
  0xfa   :  { %v435_v39 = vpop.f32.mrb[0].mxu1 }
  0xfb   :  { %v278_v40 = vpop.f32.mrb[1].mxu1  ;;  %v372_v41 = vpop.f32.mrb[2].mxu0  ;;  %v194_v42 = vadd.f32 %v371_v38, %v336_v37 }
  0xfc   :  { %v373_v43 = vpop.f32.mrb[3].mxu0 }
  0xfd   :  { %v374_v44 = vadd.f32 %v373_v43, %v372_v41  ;;  %v279_v45 = vadd.f32 %v278_v40, %v194_v42 }
  0xfe   :  { %v438_v46 = vpop.f32.mrb[2].mxu1 }
  0xff   :  { %v288_v47 = vpop.f32.mrb[3].mxu1  ;;  %v199_v48 = vadd.f32 %v374_v44, %v336_v37  ;;  %322 = vst [vmem:[%s725_s5] sm:$0xff] %v279_v45  ;;  %v375_v49 = vpop.f32.mrb[4].mxu0  ;;  %v306_v54 = vmul.f32 %v279_v45, %v279_v45 }
 0x100   :  { %v376_v50 = vpop.f32.mrb[5].mxu0 }
 0x101   :  { %v284_v51 = vadd.f32 %v435_v39, %v199_v48  ;;  %v377_v52 = vadd.f32 %v376_v50, %v375_v49 }
 0x103   :  { %323 = vst [vmem:[%s725_s5 + $0x8] sm:$0xff] %v284_v51  ;;  %v297_v53 = vadd.f32 %v284_v51, %v279_v45  ;;  %v307_v55 = vmul.f32 %v284_v51, %v284_v51  ;;  %v378_v56 = vpop.f32.mrb[6].mxu0  ;;  %v204_v57 = vadd.f32 %v377_v52, %v336_v37 }
 0x104   :  { %v379_v58 = vpop.f32.mrb[7].mxu0 }
 0x105   :  { %v310_v59 = vadd.f32 %v307_v55, %v306_v54  ;;  %v380_v60 = vadd.f32 %v379_v58, %v378_v56  ;;  %v289_v61 = vadd.f32 %v288_v47, %v204_v57 }
 0x107   :  { %v209_v62 = vadd.f32 %v380_v60, %v336_v37  ;;  %v298_v63 = vadd.f32 %v297_v53, %v289_v61  ;;  %v308_v0 = vmul.f32 %v289_v61, %v289_v61  ;;  %324 = vst [vmem:[%s725_s5 + $0x10] sm:$0xff] %v289_v61 }
 0x109   :  { %v294_v1 = vadd.f32 %v438_v46, %v209_v62  ;;  %v311_v2 = vadd.f32 %v310_v59, %v308_v0 }
 0x10b   :  { %v309_v3 = vmul.f32 %v294_v1, %v294_v1  ;;  %325 = vst [vmem:[%s725_s5 + $0x18] sm:$0xff] %v294_v1  ;;  %v299_v4 = vadd.f32 %v298_v63, %v294_v1 }
 0x10d   :  { %v300_v5 = vrot.slane %v299_v4, 4  ;;  %v312_v6 = vadd.f32 %v311_v2, %v309_v3 }
 0x10f   :  { %v301_v7 = vadd.f32 %v300_v5, %v299_v4  ;;  %v313_v8 = vrot.slane %v312_v6, 4 }
 0x111   :  { %v302_v9 = vrot.slane %v301_v7, 2  ;;  %v314_v10 = vadd.f32 %v313_v8, %v312_v6 }
 0x113   :  { %v303_v11 = vadd.f32 %v302_v9, %v301_v7  ;;  %v315_v12 = vrot.slane %v314_v10, 2 }
 0x115   :  { %v304_v13 = vrot.slane %v303_v11, 1  ;;  %v316_v14 = vadd.f32 %v315_v12, %v314_v10 }
 0x117   :  { %v317_v15 = vrot.slane %v316_v14, 1  ;;  %v305_v16 = vadd.f32 %v304_v13, %v303_v11 }
 0x119   :  { %v318_v17 = vadd.f32 %v317_v15, %v316_v14 }
 0x11b   :  { %v320_v18 = vsel %vm319_vm0, %v305_v16, %v318_v17 }
 0x11c   :  { %321 = vst [vmem:[%s726_s6] sm:$0x3] %v320_v18 }

// kernel: res_block2_forward.5
= control target key start
LH: loop header
LB: loop body
LE: loop exit
PB: predicated region body
PF: predicated region fallthrough
CT: control target
= control target key end

     0   :  { %s178_s0 = inlined_call_operand.vmem [shape: f32[32,128], index: 0, kind: input, shape index: {}]   ;;  %s179_s1 = inlined_call_operand.vmem [shape: f32[1,128], index: 1, kind: input, shape index: {}]   ;;  %s180_s2 = inlined_call_operand.vmem [shape: f32[1,128], index: 2, kind: input, shape index: {}]   ;;  %s181_s3 = inlined_call_operand.vmem [shape: f32[32,128], index: 3, kind: input, shape index: {}]   ;;  %s182_s4 = inlined_call_operand.vmem [shape: f32[1,128], index: 4, kind: input, shape index: {}]   ;;  %s183_s5 = inlined_call_operand.vmem [shape: f32[1,128], index: 5, kind: input, shape index: {}]   ;;  %s184_s6 = inlined_call_operand.vmem [shape: f32[32,128], index: 6, kind: output, shape index: {}]  }
   0x1   :  { %v23_v0 = vld [vmem:[%s181_s3] sm:$0xff]  ;;  %v24_v8 = vld [vmem:[%s181_s3 + $0x8] sm:$0xff]  ;;  %v25_v10 = vld [vmem:[%s181_s3 + $0x10] sm:$0xff] }
   0x2   :  { %v91_v1 = vld [vmem:[%s182_s4] ss:$0 sm:$0xff]  ;;  %v50_v9 = vld [vmem:[%s178_s0 + $0x8] sm:$0xff]  ;;  %v51_v15 = vld [vmem:[%s178_s0 + $0x10] sm:$0xff] }
   0x3   :  { %v92_v2 = vld [vmem:[%s183_s5] ss:$0 sm:$0xff]  ;;  %v34_v3 = vmul.f32 %v91_v1, %v23_v0  ;;  %v35_v12 = vmul.f32 %v91_v1, %v24_v8  ;;  %v36_v14 = vmul.f32 %v91_v1, %v25_v10  ;;  %v26_v16 = vld [vmem:[%s181_s3 + $0x18] sm:$0xff] }
   0x4   :  { %v49_v4 = vld [vmem:[%s178_s0] sm:$0xff]  ;;  %v52_v17 = vld [vmem:[%s178_s0 + $0x18] sm:$0xff]  ;;  %v37_v20 = vmul.f32 %v91_v1, %v26_v16 }
   0x5   :  { %v93_v5 = vld [vmem:[%s179_s1] ss:$0 sm:$0xff]  ;;  %v45_v11 = vadd.f32 %v92_v2, %v34_v3  ;;  %v46_v22 = vadd.f32 %v92_v2, %v35_v12  ;;  %v47_v24 = vadd.f32 %v92_v2, %v36_v14 }
   0x6   :  { %v94_v6 = vld [vmem:[%s180_s2] ss:$0 sm:$0xff]  ;;  %v60_v7 = vmul.f32 %v93_v5, %v49_v4  ;;  %v61_v13 = vmul.f32 %v93_v5, %v50_v9  ;;  %v62_v19 = vmul.f32 %v93_v5, %v51_v15  ;;  %v63_v21 = vmul.f32 %v93_v5, %v52_v17 }
   0x7   :  { %v48_v27 = vadd.f32 %v92_v2, %v37_v20 }
   0x8   :  { %v71_v18 = vadd.f32 %v94_v6, %v60_v7  ;;  %v72_v23 = vadd.f32 %v94_v6, %v61_v13  ;;  %v73_v26 = vadd.f32 %v94_v6, %v62_v19  ;;  %v74_v28 = vadd.f32 %v94_v6, %v63_v21 }
   0xa   :  { %v75_v25 = vadd.f32 %v71_v18, %v45_v11  ;;  %v76_v29 = vadd.f32 %v72_v23, %v46_v22  ;;  %v77_v31 = vadd.f32 %v73_v26, %v47_v24  ;;  %v78_v32 = vadd.f32 %v74_v28, %v48_v27 }
   0xc   :  { %v79_v30 = vmax.f32 %v75_v25, 0.0  ;;  %v80_v33 = vmax.f32 %v76_v29, 0.0  ;;  %v81_v34 = vmax.f32 %v77_v31, 0.0  ;;  %v82_v35 = vmax.f32 %v78_v32, 0.0 }
   0xe   :  { %83 = vst [vmem:[%s184_s6] sm:$0xff] %v79_v30  ;;  %84 = vst [vmem:[%s184_s6 + $0x8] sm:$0xff] %v80_v33 }
   0xf   :  { %85 = vst [vmem:[%s184_s6 + $0x10] sm:$0xff] %v81_v34  ;;  %86 = vst [vmem:[%s184_s6 + $0x18] sm:$0xff] %v82_v35 }

</bundles_post_ra>
